<compile_context>
chip_gen: v6e
topology: v6e:2x2x1
jax: 0.10.0
libtpu: 0.0.40
codegen_flags: <defaults>
</compile_context>

<pallas_src>
import jax
import jax.numpy as jnp
from jax.experimental import pallas as pl
from jax.experimental.pallas import tpu as pltpu

EMB_DIM = 64
H_DIM = 64
NUM_LAYERS = 1
G4 = 4 * H_DIM  # 256 lanes: gates concatenated as (i | f | o | g)


def _make_kernel(obs_len, batch):
    def kernel(obs_ref, wcomb_ref, wh_hi_ref, wh_lo_ref, bcomb_ref,
               out_ref, gx_ref):
        # ---- Input-side gate pre-activations for ALL timesteps (off the serial
        # path). K=2 contraction -> VPU broadcast-FMA, exact f32, MXU stays free.
        obs = obs_ref[...]                                    # (T*B, 2) f32
        gx_ref[...] = (obs[:, 0:1] * wcomb_ref[0:1, :]
                       + obs[:, 1:2] * wcomb_ref[1:2, :]
                       + bcomb_ref[...])                      # (T*B, 4H) f32

        h0 = jnp.zeros((batch, H_DIM), jnp.float32)
        c0 = jnp.zeros((batch, H_DIM), jnp.float32)

        def step(t, carry):
            h, c = carry
            row = pl.multiple_of(t * batch, batch)            # sublane-aligned offset
            gx_t = gx_ref[pl.ds(row, batch), :]               # (B, 4H)

            # Manual bf16_3x recurrence matmul: 3 single-pass bf16 MXU dots.
            h_hi = h.astype(jnp.bfloat16)
            h_lo = (h - h_hi.astype(jnp.float32)).astype(jnp.bfloat16)
            # Read the loop-invariant RHS from VMEM inside the step (do not pin
            # 16 vregs of weights live across the fully unrolled body).
            hh = (jnp.dot(h_hi, wh_hi_ref[...], preferred_element_type=jnp.float32)
                  + jnp.dot(h_lo, wh_hi_ref[...], preferred_element_type=jnp.float32)
                  + jnp.dot(h_hi, wh_lo_ref[...], preferred_element_type=jnp.float32))
            gates = gx_t + hh                                 # (B, 4H) f32

            # sigmoid(x) = 0.5*tanh(0.5*x) + 0.5 : one EUP op/elt instead of exp+div.
            ifo = 0.5 * jnp.tanh(0.5 * gates[:, :3 * H_DIM]) + 0.5   # (B, 3H)
            g_t = jnp.tanh(gates[:, 3 * H_DIM:])                     # (B, H)
            i_t = ifo[:, :H_DIM]
            f_t = ifo[:, H_DIM:2 * H_DIM]
            o_t = ifo[:, 2 * H_DIM:3 * H_DIM]
            c_new = f_t * c + i_t * g_t
            h_new = o_t * jnp.tanh(c_new)
            return h_new, c_new

        h_final, _ = jax.lax.fori_loop(0, obs_len, step, (h0, c0), unroll=True)
        out_ref[0, :, :] = h_final

    return kernel


@jax.jit
def fc_encoder_forward(obs_traj, w_emb, b_emb, w_x, w_h, b_gate):
    """obs_traj: (obs_len, batch, 2) f32 -> final_h: (1, batch, H_DIM) f32.

    Weight layout (pre-transposed for x @ W):
      w_emb (2, EMB), b_emb (EMB,)                     -- spatial_embedding
      w_x (4, EMB, H), w_h (4, H, H), b_gate (4, H)    -- LSTM, PyTorch gate order
                                                          (i, f, g, o), b_ih + b_hh folded.
    """
    obs_len, batch, _ = obs_traj.shape
    hp = jax.lax.Precision.HIGHEST  # folding is tiny & off the kernel path: keep exact

    # Gate reorder (i,f,g,o) -> (i,f,o,g) and lane-concat so sigmoid / tanh each
    # act on one contiguous lane slab inside the kernel.
    order = (0, 1, 3, 2)
    w_x_cat = jnp.concatenate([w_x[g] for g in order], axis=1)     # (EMB, 4H)
    w_h_cat = jnp.concatenate([w_h[g] for g in order], axis=1)     # (H, 4H)
    b_cat = jnp.concatenate([b_gate[g] for g in order], axis=0)    # (4H,)

    # Fold Linear(2 -> EMB) into the LSTM input weights (exact linear composition).
    w_comb = jnp.dot(w_emb, w_x_cat, precision=hp)                 # (2, 4H)
    b_comb = (jnp.dot(b_emb, w_x_cat, precision=hp) + b_cat).reshape(1, G4)

    # hi/lo split of the recurrence weights for the in-kernel bf16_3x matmul.
    w_h_hi = w_h_cat.astype(jnp.bfloat16)                          # (H, 4H) bf16
    w_h_lo = (w_h_cat - w_h_hi.astype(jnp.float32)).astype(jnp.bfloat16)

    # Keep batch (and every per-timestep gx row offset) a multiple of 8.
    batch_pad = ((batch + 7) // 8) * 8
    if batch_pad != batch:
        obs_traj = jnp.pad(obs_traj, ((0, 0), (0, batch_pad - batch), (0, 0)))
    obs_flat = obs_traj.reshape(obs_len * batch_pad, 2)            # (T*B, 2)

    # gx scratch = obs_len * batch * 4H * 4 bytes (64 KiB here, trivially in VMEM).
    # For production-scale obs_len this should become a time-chunked grid (chunked
    # gx + h/c carried in scratch) to stay inside v7x's 64 MiB / v5e scoped VMEM.
    vmem = pl.BlockSpec(memory_space=pltpu.MemorySpace.VMEM)
    out = pl.pallas_call(
        _make_kernel(obs_len, batch_pad),
        out_shape=jax.ShapeDtypeStruct((NUM_LAYERS, batch_pad, H_DIM), jnp.float32),
        in_specs=[vmem, vmem, vmem, vmem, vmem],
        out_specs=vmem,
        scratch_shapes=[
            pltpu.VMEM((obs_len * batch_pad, G4), jnp.float32),  # all input-side gate pre-acts
        ],
    )(obs_flat, w_comb, w_h_hi, w_h_lo, b_comb)
    return out[:, :batch, :]


def fc_encoder_reference(obs_traj, w_emb, b_emb, w_x, w_h, b_gate):
    """Pure-JAX reference of the same forward pass (exact-f32 matmuls)."""
    obs_len, batch, _ = obs_traj.shape
    hp = jax.lax.Precision.HIGHEST
    emb = jnp.einsum('tbi,ie->tbe', obs_traj, w_emb, precision=hp) + b_emb  # (T, B, E)
    h = jnp.zeros((batch, H_DIM), jnp.float32)
    c = jnp.zeros((batch, H_DIM), jnp.float32)

    def step(carry, x_t):
        h, c = carry
        gates = [jnp.dot(x_t, w_x[g], precision=hp)
                 + jnp.dot(h, w_h[g], precision=hp) + b_gate[g]
                 for g in range(4)]
        i_g = jax.nn.sigmoid(gates[0])
        f_g = jax.nn.sigmoid(gates[1])
        g_g = jnp.tanh(gates[2])
        o_g = jax.nn.sigmoid(gates[3])
        c_new = f_g * c + i_g * g_g
        h_new = o_g * jnp.tanh(c_new)
        return (h_new, c_new), None

    (h, c), _ = jax.lax.scan(step, (h, c), emb)
    return h[None, :, :]


if __name__ == "__main__":
    obs_len, batch = 8, 8

    key = jax.random.PRNGKey(0)
    k_obs, k_we, k_be, k_wx, k_wh, k_b = jax.random.split(key, 6)

    scale = 1.0 / jnp.sqrt(jnp.float32(H_DIM))
    obs_traj = jax.random.normal(k_obs, (obs_len, batch, 2), jnp.float32)
    # spatial_embedding: Linear(2, EMB_DIM) -> stored as (2, EMB_DIM) = A^T
    w_emb = jax.random.uniform(k_we, (2, EMB_DIM), jnp.float32, -scale, scale)
    b_emb = jax.random.uniform(k_be, (EMB_DIM,), jnp.float32, -scale, scale)
    # LSTM weights, stacked per gate (i, f, g, o), pre-transposed for x @ W
    w_x = jax.random.uniform(k_wx, (4, EMB_DIM, H_DIM), jnp.float32, -scale, scale)
    w_h = jax.random.uniform(k_wh, (4, H_DIM, H_DIM), jnp.float32, -scale, scale)
    b_gate = jax.random.uniform(k_b, (4, H_DIM), jnp.float32, -scale, scale)  # b_ih + b_hh

    final_h = fc_encoder_forward(obs_traj, w_emb, b_emb, w_x, w_h, b_gate)
    final_h = jax.block_until_ready(final_h)

    ref_h = fc_encoder_reference(obs_traj, w_emb, b_emb, w_x, w_h, b_gate)
    assert final_h.shape == (NUM_LAYERS, batch, H_DIM)
    err = jnp.max(jnp.abs(final_h - ref_h))
    # bf16_3x recurrence matmul -> expect ~1e-6 abs error vs the exact-f32 reference.
    assert jnp.allclose(final_h, ref_h, atol=5e-5, rtol=5e-5), f"max abs err {err}"

    print("KERNEL_OK")
</pallas_src>

<mosaic_0001>
module attributes {stable_mosaic.version = 11 : i64} {
  func.func @kernel(%arg0: memref<64x2xf32, #tpu.memory_space<vmem>>, %arg1: memref<2x256xf32, #tpu.memory_space<vmem>>, %arg2: memref<64x256xbf16, #tpu.memory_space<vmem>>, %arg3: memref<64x256xbf16, #tpu.memory_space<vmem>>, %arg4: memref<1x256xf32, #tpu.memory_space<vmem>>, %arg5: memref<1x8x64xf32, #tpu.memory_space<vmem>>, %arg6: memref<64x256xf32, #tpu.memory_space<vmem>>) attributes {dimension_semantics = [], scalar_prefetch = 0 : i64, scratch_operands = 1 : i64, tpu.core_type = #tpu.core_type<tc>} {
    %c0 = arith.constant 0 : index
    %c0_0 = arith.constant 0 : index
    %0 = vector.load %arg0[%c0, %c0_0] : memref<64x2xf32, #tpu.memory_space<vmem>>, vector<64x2xf32>
    %1 = vector.extract_strided_slice %0 {offsets = [0, 0], sizes = [64, 1], strides = [1, 1]} : vector<64x2xf32> to vector<64x1xf32>
    %c0_1 = arith.constant 0 : index
    %c0_2 = arith.constant 0 : index
    %2 = vector.load %arg1[%c0_1, %c0_2] : memref<2x256xf32, #tpu.memory_space<vmem>>, vector<1x256xf32>
    %3 = vector.broadcast %1 : vector<64x1xf32> to vector<64x256xf32>
    %4 = vector.broadcast %2 : vector<1x256xf32> to vector<64x256xf32>
    %5 = arith.mulf %3, %4 : vector<64x256xf32>
    %6 = vector.extract_strided_slice %0 {offsets = [0, 1], sizes = [64, 1], strides = [1, 1]} : vector<64x2xf32> to vector<64x1xf32>
    %c1 = arith.constant 1 : index
    %c0_3 = arith.constant 0 : index
    %7 = vector.load %arg1[%c1, %c0_3] : memref<2x256xf32, #tpu.memory_space<vmem>>, vector<1x256xf32>
    %8 = vector.broadcast %6 : vector<64x1xf32> to vector<64x256xf32>
    %9 = vector.broadcast %7 : vector<1x256xf32> to vector<64x256xf32>
    %10 = arith.mulf %8, %9 : vector<64x256xf32>
    %11 = arith.addf %5, %10 : vector<64x256xf32>
    %c0_4 = arith.constant 0 : index
    %c0_5 = arith.constant 0 : index
    %12 = vector.load %arg4[%c0_4, %c0_5] : memref<1x256xf32, #tpu.memory_space<vmem>>, vector<1x256xf32>
    %13 = vector.broadcast %12 : vector<1x256xf32> to vector<64x256xf32>
    %14 = arith.addf %11, %13 : vector<64x256xf32>
    %c0_6 = arith.constant 0 : index
    %c0_7 = arith.constant 0 : index
    %15 = vector.load %arg6[%c0_6, %c0_7] : memref<64x256xf32, #tpu.memory_space<vmem>>, vector<64x256xf32>
    tpu.vector_store %arg6[%c0_6, %c0_7], %14 {strides = array<i32>} : memref<64x256xf32, #tpu.memory_space<vmem>>, vector<64x256xf32>,
    %cst = arith.constant 0.000000e+00 : f32
    %16 = vector.broadcast %cst : f32 to vector<8x64xf32>
    %cst_8 = arith.constant 0.000000e+00 : f32
    %17 = vector.broadcast %cst_8 : f32 to vector<8x64xf32>
    %c0_i32 = arith.constant 0 : i32
    %c8_i32 = arith.constant 8 : i32
    %18 = arith.muli %c0_i32, %c8_i32 : i32
    %19 = tpu.assume_multiple %18, 8 : i32
    %20 = arith.index_cast %19 : i32 to index
    %c0_9 = arith.constant 0 : index
    %21 = vector.load %arg6[%20, %c0_9] : memref<64x256xf32, #tpu.memory_space<vmem>>, vector<8x256xf32>
    %22 = arith.truncf %16 : vector<8x64xf32> to vector<8x64xbf16>
    %23 = arith.extf %22 : vector<8x64xbf16> to vector<8x64xf32>
    %24 = arith.subf %16, %23 : vector<8x64xf32>
    %25 = arith.truncf %24 : vector<8x64xf32> to vector<8x64xbf16>
    %c0_10 = arith.constant 0 : index
    %c0_11 = arith.constant 0 : index
    %26 = vector.load %arg2[%c0_10, %c0_11] : memref<64x256xbf16, #tpu.memory_space<vmem>>, vector<64x256xbf16>
    %cst_12 = arith.constant dense<0.000000e+00> : vector<8x256xf32>
    %27 = tpu.matmul %22, %26, %cst_12 {dimension_numbers = #tpu.dot_dimension_numbers<[1], [0], [0], [1], [0, 0, 1, 1], [], []>} : vector<8x64xbf16>, vector<64x256xbf16>, vector<8x256xf32> -> vector<8x256xf32>
    %c0_13 = arith.constant 0 : index
    %c0_14 = arith.constant 0 : index
    %28 = vector.load %arg2[%c0_13, %c0_14] : memref<64x256xbf16, #tpu.memory_space<vmem>>, vector<64x256xbf16>
    %cst_15 = arith.constant dense<0.000000e+00> : vector<8x256xf32>
    %29 = tpu.matmul %25, %28, %cst_15 {dimension_numbers = #tpu.dot_dimension_numbers<[1], [0], [0], [1], [0, 0, 1, 1], [], []>} : vector<8x64xbf16>, vector<64x256xbf16>, vector<8x256xf32> -> vector<8x256xf32>
    %30 = arith.addf %27, %29 : vector<8x256xf32>
    %c0_16 = arith.constant 0 : index
    %c0_17 = arith.constant 0 : index
    %31 = vector.load %arg3[%c0_16, %c0_17] : memref<64x256xbf16, #tpu.memory_space<vmem>>, vector<64x256xbf16>
    %cst_18 = arith.constant dense<0.000000e+00> : vector<8x256xf32>
    %32 = tpu.matmul %22, %31, %cst_18 {dimension_numbers = #tpu.dot_dimension_numbers<[1], [0], [0], [1], [0, 0, 1, 1], [], []>} : vector<8x64xbf16>, vector<64x256xbf16>, vector<8x256xf32> -> vector<8x256xf32>
    %33 = arith.addf %30, %32 : vector<8x256xf32>
    %34 = arith.addf %21, %33 : vector<8x256xf32>
    %35 = vector.extract_strided_slice %34 {offsets = [0, 0], sizes = [8, 192], strides = [1, 1]} : vector<8x256xf32> to vector<8x192xf32>
    %cst_19 = arith.constant 5.000000e-01 : f32
    %36 = vector.broadcast %cst_19 : f32 to vector<8x192xf32>
    %37 = arith.mulf %36, %35 : vector<8x192xf32>
    %38 = math.tanh %37 : vector<8x192xf32>
    %cst_20 = arith.constant 5.000000e-01 : f32
    %39 = vector.broadcast %cst_20 : f32 to vector<8x192xf32>
    %40 = arith.mulf %39, %38 : vector<8x192xf32>
    %cst_21 = arith.constant 5.000000e-01 : f32
    %41 = vector.broadcast %cst_21 : f32 to vector<8x192xf32>
    %42 = arith.addf %40, %41 : vector<8x192xf32>
    %43 = vector.extract_strided_slice %34 {offsets = [0, 192], sizes = [8, 64], strides = [1, 1]} : vector<8x256xf32> to vector<8x64xf32>
    %44 = math.tanh %43 : vector<8x64xf32>
    %45 = vector.extract_strided_slice %42 {offsets = [0, 0], sizes = [8, 64], strides = [1, 1]} : vector<8x192xf32> to vector<8x64xf32>
    %46 = vector.extract_strided_slice %42 {offsets = [0, 64], sizes = [8, 64], strides = [1, 1]} : vector<8x192xf32> to vector<8x64xf32>
    %47 = vector.extract_strided_slice %42 {offsets = [0, 128], sizes = [8, 64], strides = [1, 1]} : vector<8x192xf32> to vector<8x64xf32>
    %48 = arith.mulf %46, %17 : vector<8x64xf32>
    %49 = arith.mulf %45, %44 : vector<8x64xf32>
    %50 = arith.addf %48, %49 : vector<8x64xf32>
    %51 = math.tanh %50 : vector<8x64xf32>
    %52 = arith.mulf %47, %51 : vector<8x64xf32>
    %c1_i32 = arith.constant 1 : i32
    %c8_i32_22 = arith.constant 8 : i32
    %53 = arith.muli %c1_i32, %c8_i32_22 : i32
    %54 = tpu.assume_multiple %53, 8 : i32
    %55 = arith.index_cast %54 : i32 to index
    %c0_23 = arith.constant 0 : index
    %56 = vector.load %arg6[%55, %c0_23] : memref<64x256xf32, #tpu.memory_space<vmem>>, vector<8x256xf32>
    %57 = arith.truncf %52 : vector<8x64xf32> to vector<8x64xbf16>
    %58 = arith.extf %57 : vector<8x64xbf16> to vector<8x64xf32>
    %59 = arith.subf %52, %58 : vector<8x64xf32>
    %60 = arith.truncf %59 : vector<8x64xf32> to vector<8x64xbf16>
    %c0_24 = arith.constant 0 : index
    %c0_25 = arith.constant 0 : index
    %61 = vector.load %arg2[%c0_24, %c0_25] : memref<64x256xbf16, #tpu.memory_space<vmem>>, vector<64x256xbf16>
    %cst_26 = arith.constant dense<0.000000e+00> : vector<8x256xf32>
    %62 = tpu.matmul %57, %61, %cst_26 {dimension_numbers = #tpu.dot_dimension_numbers<[1], [0], [0], [1], [0, 0, 1, 1], [], []>} : vector<8x64xbf16>, vector<64x256xbf16>, vector<8x256xf32> -> vector<8x256xf32>
    %c0_27 = arith.constant 0 : index
    %c0_28 = arith.constant 0 : index
    %63 = vector.load %arg2[%c0_27, %c0_28] : memref<64x256xbf16, #tpu.memory_space<vmem>>, vector<64x256xbf16>
    %cst_29 = arith.constant dense<0.000000e+00> : vector<8x256xf32>
    %64 = tpu.matmul %60, %63, %cst_29 {dimension_numbers = #tpu.dot_dimension_numbers<[1], [0], [0], [1], [0, 0, 1, 1], [], []>} : vector<8x64xbf16>, vector<64x256xbf16>, vector<8x256xf32> -> vector<8x256xf32>
    %65 = arith.addf %62, %64 : vector<8x256xf32>
    %c0_30 = arith.constant 0 : index
    %c0_31 = arith.constant 0 : index
    %66 = vector.load %arg3[%c0_30, %c0_31] : memref<64x256xbf16, #tpu.memory_space<vmem>>, vector<64x256xbf16>
    %cst_32 = arith.constant dense<0.000000e+00> : vector<8x256xf32>
    %67 = tpu.matmul %57, %66, %cst_32 {dimension_numbers = #tpu.dot_dimension_numbers<[1], [0], [0], [1], [0, 0, 1, 1], [], []>} : vector<8x64xbf16>, vector<64x256xbf16>, vector<8x256xf32> -> vector<8x256xf32>
    %68 = arith.addf %65, %67 : vector<8x256xf32>
    %69 = arith.addf %56, %68 : vector<8x256xf32>
    %70 = vector.extract_strided_slice %69 {offsets = [0, 0], sizes = [8, 192], strides = [1, 1]} : vector<8x256xf32> to vector<8x192xf32>
    %cst_33 = arith.constant 5.000000e-01 : f32
    %71 = vector.broadcast %cst_33 : f32 to vector<8x192xf32>
    %72 = arith.mulf %71, %70 : vector<8x192xf32>
    %73 = math.tanh %72 : vector<8x192xf32>
    %cst_34 = arith.constant 5.000000e-01 : f32
    %74 = vector.broadcast %cst_34 : f32 to vector<8x192xf32>
    %75 = arith.mulf %74, %73 : vector<8x192xf32>
    %cst_35 = arith.constant 5.000000e-01 : f32
    %76 = vector.broadcast %cst_35 : f32 to vector<8x192xf32>
    %77 = arith.addf %75, %76 : vector<8x192xf32>
    %78 = vector.extract_strided_slice %69 {offsets = [0, 192], sizes = [8, 64], strides = [1, 1]} : vector<8x256xf32> to vector<8x64xf32>
    %79 = math.tanh %78 : vector<8x64xf32>
    %80 = vector.extract_strided_slice %77 {offsets = [0, 0], sizes = [8, 64], strides = [1, 1]} : vector<8x192xf32> to vector<8x64xf32>
    %81 = vector.extract_strided_slice %77 {offsets = [0, 64], sizes = [8, 64], strides = [1, 1]} : vector<8x192xf32> to vector<8x64xf32>
    %82 = vector.extract_strided_slice %77 {offsets = [0, 128], sizes = [8, 64], strides = [1, 1]} : vector<8x192xf32> to vector<8x64xf32>
    %83 = arith.mulf %81, %50 : vector<8x64xf32>
    %84 = arith.mulf %80, %79 : vector<8x64xf32>
    %85 = arith.addf %83, %84 : vector<8x64xf32>
    %86 = math.tanh %85 : vector<8x64xf32>
    %87 = arith.mulf %82, %86 : vector<8x64xf32>
    %c2_i32 = arith.constant 2 : i32
    %c8_i32_36 = arith.constant 8 : i32
    %88 = arith.muli %c2_i32, %c8_i32_36 : i32
    %89 = tpu.assume_multiple %88, 8 : i32
    %90 = arith.index_cast %89 : i32 to index
    %c0_37 = arith.constant 0 : index
    %91 = vector.load %arg6[%90, %c0_37] : memref<64x256xf32, #tpu.memory_space<vmem>>, vector<8x256xf32>
    %92 = arith.truncf %87 : vector<8x64xf32> to vector<8x64xbf16>
    %93 = arith.extf %92 : vector<8x64xbf16> to vector<8x64xf32>
    %94 = arith.subf %87, %93 : vector<8x64xf32>
    %95 = arith.truncf %94 : vector<8x64xf32> to vector<8x64xbf16>
    %c0_38 = arith.constant 0 : index
    %c0_39 = arith.constant 0 : index
    %96 = vector.load %arg2[%c0_38, %c0_39] : memref<64x256xbf16, #tpu.memory_space<vmem>>, vector<64x256xbf16>
    %cst_40 = arith.constant dense<0.000000e+00> : vector<8x256xf32>
    %97 = tpu.matmul %92, %96, %cst_40 {dimension_numbers = #tpu.dot_dimension_numbers<[1], [0], [0], [1], [0, 0, 1, 1], [], []>} : vector<8x64xbf16>, vector<64x256xbf16>, vector<8x256xf32> -> vector<8x256xf32>
    %c0_41 = arith.constant 0 : index
    %c0_42 = arith.constant 0 : index
    %98 = vector.load %arg2[%c0_41, %c0_42] : memref<64x256xbf16, #tpu.memory_space<vmem>>, vector<64x256xbf16>
    %cst_43 = arith.constant dense<0.000000e+00> : vector<8x256xf32>
    %99 = tpu.matmul %95, %98, %cst_43 {dimension_numbers = #tpu.dot_dimension_numbers<[1], [0], [0], [1], [0, 0, 1, 1], [], []>} : vector<8x64xbf16>, vector<64x256xbf16>, vector<8x256xf32> -> vector<8x256xf32>
    %100 = arith.addf %97, %99 : vector<8x256xf32>
    %c0_44 = arith.constant 0 : index
    %c0_45 = arith.constant 0 : index
    %101 = vector.load %arg3[%c0_44, %c0_45] : memref<64x256xbf16, #tpu.memory_space<vmem>>, vector<64x256xbf16>
    %cst_46 = arith.constant dense<0.000000e+00> : vector<8x256xf32>
    %102 = tpu.matmul %92, %101, %cst_46 {dimension_numbers = #tpu.dot_dimension_numbers<[1], [0], [0], [1], [0, 0, 1, 1], [], []>} : vector<8x64xbf16>, vector<64x256xbf16>, vector<8x256xf32> -> vector<8x256xf32>
    %103 = arith.addf %100, %102 : vector<8x256xf32>
    %104 = arith.addf %91, %103 : vector<8x256xf32>
    %105 = vector.extract_strided_slice %104 {offsets = [0, 0], sizes = [8, 192], strides = [1, 1]} : vector<8x256xf32> to vector<8x192xf32>
    %cst_47 = arith.constant 5.000000e-01 : f32
    %106 = vector.broadcast %cst_47 : f32 to vector<8x192xf32>
    %107 = arith.mulf %106, %105 : vector<8x192xf32>
    %108 = math.tanh %107 : vector<8x192xf32>
    %cst_48 = arith.constant 5.000000e-01 : f32
    %109 = vector.broadcast %cst_48 : f32 to vector<8x192xf32>
    %110 = arith.mulf %109, %108 : vector<8x192xf32>
    %cst_49 = arith.constant 5.000000e-01 : f32
    %111 = vector.broadcast %cst_49 : f32 to vector<8x192xf32>
    %112 = arith.addf %110, %111 : vector<8x192xf32>
    %113 = vector.extract_strided_slice %104 {offsets = [0, 192], sizes = [8, 64], strides = [1, 1]} : vector<8x256xf32> to vector<8x64xf32>
    %114 = math.tanh %113 : vector<8x64xf32>
    %115 = vector.extract_strided_slice %112 {offsets = [0, 0], sizes = [8, 64], strides = [1, 1]} : vector<8x192xf32> to vector<8x64xf32>
    %116 = vector.extract_strided_slice %112 {offsets = [0, 64], sizes = [8, 64], strides = [1, 1]} : vector<8x192xf32> to vector<8x64xf32>
    %117 = vector.extract_strided_slice %112 {offsets = [0, 128], sizes = [8, 64], strides = [1, 1]} : vector<8x192xf32> to vector<8x64xf32>
    %118 = arith.mulf %116, %85 : vector<8x64xf32>
    %119 = arith.mulf %115, %114 : vector<8x64xf32>
    %120 = arith.addf %118, %119 : vector<8x64xf32>
    %121 = math.tanh %120 : vector<8x64xf32>
    %122 = arith.mulf %117, %121 : vector<8x64xf32>
    %c3_i32 = arith.constant 3 : i32
    %c8_i32_50 = arith.constant 8 : i32
    %123 = arith.muli %c3_i32, %c8_i32_50 : i32
    %124 = tpu.assume_multiple %123, 8 : i32
    %125 = arith.index_cast %124 : i32 to index
    %c0_51 = arith.constant 0 : index
    %126 = vector.load %arg6[%125, %c0_51] : memref<64x256xf32, #tpu.memory_space<vmem>>, vector<8x256xf32>
    %127 = arith.truncf %122 : vector<8x64xf32> to vector<8x64xbf16>
    %128 = arith.extf %127 : vector<8x64xbf16> to vector<8x64xf32>
    %129 = arith.subf %122, %128 : vector<8x64xf32>
    %130 = arith.truncf %129 : vector<8x64xf32> to vector<8x64xbf16>
    %c0_52 = arith.constant 0 : index
    %c0_53 = arith.constant 0 : index
    %131 = vector.load %arg2[%c0_52, %c0_53] : memref<64x256xbf16, #tpu.memory_space<vmem>>, vector<64x256xbf16>
    %cst_54 = arith.constant dense<0.000000e+00> : vector<8x256xf32>
    %132 = tpu.matmul %127, %131, %cst_54 {dimension_numbers = #tpu.dot_dimension_numbers<[1], [0], [0], [1], [0, 0, 1, 1], [], []>} : vector<8x64xbf16>, vector<64x256xbf16>, vector<8x256xf32> -> vector<8x256xf32>
    %c0_55 = arith.constant 0 : index
    %c0_56 = arith.constant 0 : index
    %133 = vector.load %arg2[%c0_55, %c0_56] : memref<64x256xbf16, #tpu.memory_space<vmem>>, vector<64x256xbf16>
    %cst_57 = arith.constant dense<0.000000e+00> : vector<8x256xf32>
    %134 = tpu.matmul %130, %133, %cst_57 {dimension_numbers = #tpu.dot_dimension_numbers<[1], [0], [0], [1], [0, 0, 1, 1], [], []>} : vector<8x64xbf16>, vector<64x256xbf16>, vector<8x256xf32> -> vector<8x256xf32>
    %135 = arith.addf %132, %134 : vector<8x256xf32>
    %c0_58 = arith.constant 0 : index
    %c0_59 = arith.constant 0 : index
    %136 = vector.load %arg3[%c0_58, %c0_59] : memref<64x256xbf16, #tpu.memory_space<vmem>>, vector<64x256xbf16>
    %cst_60 = arith.constant dense<0.000000e+00> : vector<8x256xf32>
    %137 = tpu.matmul %127, %136, %cst_60 {dimension_numbers = #tpu.dot_dimension_numbers<[1], [0], [0], [1], [0, 0, 1, 1], [], []>} : vector<8x64xbf16>, vector<64x256xbf16>, vector<8x256xf32> -> vector<8x256xf32>
    %138 = arith.addf %135, %137 : vector<8x256xf32>
    %139 = arith.addf %126, %138 : vector<8x256xf32>
    %140 = vector.extract_strided_slice %139 {offsets = [0, 0], sizes = [8, 192], strides = [1, 1]} : vector<8x256xf32> to vector<8x192xf32>
    %cst_61 = arith.constant 5.000000e-01 : f32
    %141 = vector.broadcast %cst_61 : f32 to vector<8x192xf32>
    %142 = arith.mulf %141, %140 : vector<8x192xf32>
    %143 = math.tanh %142 : vector<8x192xf32>
    %cst_62 = arith.constant 5.000000e-01 : f32
    %144 = vector.broadcast %cst_62 : f32 to vector<8x192xf32>
    %145 = arith.mulf %144, %143 : vector<8x192xf32>
    %cst_63 = arith.constant 5.000000e-01 : f32
    %146 = vector.broadcast %cst_63 : f32 to vector<8x192xf32>
    %147 = arith.addf %145, %146 : vector<8x192xf32>
    %148 = vector.extract_strided_slice %139 {offsets = [0, 192], sizes = [8, 64], strides = [1, 1]} : vector<8x256xf32> to vector<8x64xf32>
    %149 = math.tanh %148 : vector<8x64xf32>
    %150 = vector.extract_strided_slice %147 {offsets = [0, 0], sizes = [8, 64], strides = [1, 1]} : vector<8x192xf32> to vector<8x64xf32>
    %151 = vector.extract_strided_slice %147 {offsets = [0, 64], sizes = [8, 64], strides = [1, 1]} : vector<8x192xf32> to vector<8x64xf32>
    %152 = vector.extract_strided_slice %147 {offsets = [0, 128], sizes = [8, 64], strides = [1, 1]} : vector<8x192xf32> to vector<8x64xf32>
    %153 = arith.mulf %151, %120 : vector<8x64xf32>
    %154 = arith.mulf %150, %149 : vector<8x64xf32>
    %155 = arith.addf %153, %154 : vector<8x64xf32>
    %156 = math.tanh %155 : vector<8x64xf32>
    %157 = arith.mulf %152, %156 : vector<8x64xf32>
    %c4_i32 = arith.constant 4 : i32
    %c8_i32_64 = arith.constant 8 : i32
    %158 = arith.muli %c4_i32, %c8_i32_64 : i32
    %159 = tpu.assume_multiple %158, 8 : i32
    %160 = arith.index_cast %159 : i32 to index
    %c0_65 = arith.constant 0 : index
    %161 = vector.load %arg6[%160, %c0_65] : memref<64x256xf32, #tpu.memory_space<vmem>>, vector<8x256xf32>
    %162 = arith.truncf %157 : vector<8x64xf32> to vector<8x64xbf16>
    %163 = arith.extf %162 : vector<8x64xbf16> to vector<8x64xf32>
    %164 = arith.subf %157, %163 : vector<8x64xf32>
    %165 = arith.truncf %164 : vector<8x64xf32> to vector<8x64xbf16>
    %c0_66 = arith.constant 0 : index
    %c0_67 = arith.constant 0 : index
    %166 = vector.load %arg2[%c0_66, %c0_67] : memref<64x256xbf16, #tpu.memory_space<vmem>>, vector<64x256xbf16>
    %cst_68 = arith.constant dense<0.000000e+00> : vector<8x256xf32>
    %167 = tpu.matmul %162, %166, %cst_68 {dimension_numbers = #tpu.dot_dimension_numbers<[1], [0], [0], [1], [0, 0, 1, 1], [], []>} : vector<8x64xbf16>, vector<64x256xbf16>, vector<8x256xf32> -> vector<8x256xf32>
    %c0_69 = arith.constant 0 : index
    %c0_70 = arith.constant 0 : index
    %168 = vector.load %arg2[%c0_69, %c0_70] : memref<64x256xbf16, #tpu.memory_space<vmem>>, vector<64x256xbf16>
    %cst_71 = arith.constant dense<0.000000e+00> : vector<8x256xf32>
    %169 = tpu.matmul %165, %168, %cst_71 {dimension_numbers = #tpu.dot_dimension_numbers<[1], [0], [0], [1], [0, 0, 1, 1], [], []>} : vector<8x64xbf16>, vector<64x256xbf16>, vector<8x256xf32> -> vector<8x256xf32>
    %170 = arith.addf %167, %169 : vector<8x256xf32>
    %c0_72 = arith.constant 0 : index
    %c0_73 = arith.constant 0 : index
    %171 = vector.load %arg3[%c0_72, %c0_73] : memref<64x256xbf16, #tpu.memory_space<vmem>>, vector<64x256xbf16>
    %cst_74 = arith.constant dense<0.000000e+00> : vector<8x256xf32>
    %172 = tpu.matmul %162, %171, %cst_74 {dimension_numbers = #tpu.dot_dimension_numbers<[1], [0], [0], [1], [0, 0, 1, 1], [], []>} : vector<8x64xbf16>, vector<64x256xbf16>, vector<8x256xf32> -> vector<8x256xf32>
    %173 = arith.addf %170, %172 : vector<8x256xf32>
    %174 = arith.addf %161, %173 : vector<8x256xf32>
    %175 = vector.extract_strided_slice %174 {offsets = [0, 0], sizes = [8, 192], strides = [1, 1]} : vector<8x256xf32> to vector<8x192xf32>
    %cst_75 = arith.constant 5.000000e-01 : f32
    %176 = vector.broadcast %cst_75 : f32 to vector<8x192xf32>
    %177 = arith.mulf %176, %175 : vector<8x192xf32>
    %178 = math.tanh %177 : vector<8x192xf32>
    %cst_76 = arith.constant 5.000000e-01 : f32
    %179 = vector.broadcast %cst_76 : f32 to vector<8x192xf32>
    %180 = arith.mulf %179, %178 : vector<8x192xf32>
    %cst_77 = arith.constant 5.000000e-01 : f32
    %181 = vector.broadcast %cst_77 : f32 to vector<8x192xf32>
    %182 = arith.addf %180, %181 : vector<8x192xf32>
    %183 = vector.extract_strided_slice %174 {offsets = [0, 192], sizes = [8, 64], strides = [1, 1]} : vector<8x256xf32> to vector<8x64xf32>
    %184 = math.tanh %183 : vector<8x64xf32>
    %185 = vector.extract_strided_slice %182 {offsets = [0, 0], sizes = [8, 64], strides = [1, 1]} : vector<8x192xf32> to vector<8x64xf32>
    %186 = vector.extract_strided_slice %182 {offsets = [0, 64], sizes = [8, 64], strides = [1, 1]} : vector<8x192xf32> to vector<8x64xf32>
    %187 = vector.extract_strided_slice %182 {offsets = [0, 128], sizes = [8, 64], strides = [1, 1]} : vector<8x192xf32> to vector<8x64xf32>
    %188 = arith.mulf %186, %155 : vector<8x64xf32>
    %189 = arith.mulf %185, %184 : vector<8x64xf32>
    %190 = arith.addf %188, %189 : vector<8x64xf32>
    %191 = math.tanh %190 : vector<8x64xf32>
    %192 = arith.mulf %187, %191 : vector<8x64xf32>
    %c5_i32 = arith.constant 5 : i32
    %c8_i32_78 = arith.constant 8 : i32
    %193 = arith.muli %c5_i32, %c8_i32_78 : i32
    %194 = tpu.assume_multiple %193, 8 : i32
    %195 = arith.index_cast %194 : i32 to index
    %c0_79 = arith.constant 0 : index
    %196 = vector.load %arg6[%195, %c0_79] : memref<64x256xf32, #tpu.memory_space<vmem>>, vector<8x256xf32>
    %197 = arith.truncf %192 : vector<8x64xf32> to vector<8x64xbf16>
    %198 = arith.extf %197 : vector<8x64xbf16> to vector<8x64xf32>
    %199 = arith.subf %192, %198 : vector<8x64xf32>
    %200 = arith.truncf %199 : vector<8x64xf32> to vector<8x64xbf16>
    %c0_80 = arith.constant 0 : index
    %c0_81 = arith.constant 0 : index
    %201 = vector.load %arg2[%c0_80, %c0_81] : memref<64x256xbf16, #tpu.memory_space<vmem>>, vector<64x256xbf16>
    %cst_82 = arith.constant dense<0.000000e+00> : vector<8x256xf32>
    %202 = tpu.matmul %197, %201, %cst_82 {dimension_numbers = #tpu.dot_dimension_numbers<[1], [0], [0], [1], [0, 0, 1, 1], [], []>} : vector<8x64xbf16>, vector<64x256xbf16>, vector<8x256xf32> -> vector<8x256xf32>
    %c0_83 = arith.constant 0 : index
    %c0_84 = arith.constant 0 : index
    %203 = vector.load %arg2[%c0_83, %c0_84] : memref<64x256xbf16, #tpu.memory_space<vmem>>, vector<64x256xbf16>
    %cst_85 = arith.constant dense<0.000000e+00> : vector<8x256xf32>
    %204 = tpu.matmul %200, %203, %cst_85 {dimension_numbers = #tpu.dot_dimension_numbers<[1], [0], [0], [1], [0, 0, 1, 1], [], []>} : vector<8x64xbf16>, vector<64x256xbf16>, vector<8x256xf32> -> vector<8x256xf32>
    %205 = arith.addf %202, %204 : vector<8x256xf32>
    %c0_86 = arith.constant 0 : index
    %c0_87 = arith.constant 0 : index
    %206 = vector.load %arg3[%c0_86, %c0_87] : memref<64x256xbf16, #tpu.memory_space<vmem>>, vector<64x256xbf16>
    %cst_88 = arith.constant dense<0.000000e+00> : vector<8x256xf32>
    %207 = tpu.matmul %197, %206, %cst_88 {dimension_numbers = #tpu.dot_dimension_numbers<[1], [0], [0], [1], [0, 0, 1, 1], [], []>} : vector<8x64xbf16>, vector<64x256xbf16>, vector<8x256xf32> -> vector<8x256xf32>
    %208 = arith.addf %205, %207 : vector<8x256xf32>
    %209 = arith.addf %196, %208 : vector<8x256xf32>
    %210 = vector.extract_strided_slice %209 {offsets = [0, 0], sizes = [8, 192], strides = [1, 1]} : vector<8x256xf32> to vector<8x192xf32>
    %cst_89 = arith.constant 5.000000e-01 : f32
    %211 = vector.broadcast %cst_89 : f32 to vector<8x192xf32>
    %212 = arith.mulf %211, %210 : vector<8x192xf32>
    %213 = math.tanh %212 : vector<8x192xf32>
    %cst_90 = arith.constant 5.000000e-01 : f32
    %214 = vector.broadcast %cst_90 : f32 to vector<8x192xf32>
    %215 = arith.mulf %214, %213 : vector<8x192xf32>
    %cst_91 = arith.constant 5.000000e-01 : f32
    %216 = vector.broadcast %cst_91 : f32 to vector<8x192xf32>
    %217 = arith.addf %215, %216 : vector<8x192xf32>
    %218 = vector.extract_strided_slice %209 {offsets = [0, 192], sizes = [8, 64], strides = [1, 1]} : vector<8x256xf32> to vector<8x64xf32>
    %219 = math.tanh %218 : vector<8x64xf32>
    %220 = vector.extract_strided_slice %217 {offsets = [0, 0], sizes = [8, 64], strides = [1, 1]} : vector<8x192xf32> to vector<8x64xf32>
    %221 = vector.extract_strided_slice %217 {offsets = [0, 64], sizes = [8, 64], strides = [1, 1]} : vector<8x192xf32> to vector<8x64xf32>
    %222 = vector.extract_strided_slice %217 {offsets = [0, 128], sizes = [8, 64], strides = [1, 1]} : vector<8x192xf32> to vector<8x64xf32>
    %223 = arith.mulf %221, %190 : vector<8x64xf32>
    %224 = arith.mulf %220, %219 : vector<8x64xf32>
    %225 = arith.addf %223, %224 : vector<8x64xf32>
    %226 = math.tanh %225 : vector<8x64xf32>
    %227 = arith.mulf %222, %226 : vector<8x64xf32>
    %c6_i32 = arith.constant 6 : i32
    %c8_i32_92 = arith.constant 8 : i32
    %228 = arith.muli %c6_i32, %c8_i32_92 : i32
    %229 = tpu.assume_multiple %228, 8 : i32
    %230 = arith.index_cast %229 : i32 to index
    %c0_93 = arith.constant 0 : index
    %231 = vector.load %arg6[%230, %c0_93] : memref<64x256xf32, #tpu.memory_space<vmem>>, vector<8x256xf32>
    %232 = arith.truncf %227 : vector<8x64xf32> to vector<8x64xbf16>
    %233 = arith.extf %232 : vector<8x64xbf16> to vector<8x64xf32>
    %234 = arith.subf %227, %233 : vector<8x64xf32>
    %235 = arith.truncf %234 : vector<8x64xf32> to vector<8x64xbf16>
    %c0_94 = arith.constant 0 : index
    %c0_95 = arith.constant 0 : index
    %236 = vector.load %arg2[%c0_94, %c0_95] : memref<64x256xbf16, #tpu.memory_space<vmem>>, vector<64x256xbf16>
    %cst_96 = arith.constant dense<0.000000e+00> : vector<8x256xf32>
    %237 = tpu.matmul %232, %236, %cst_96 {dimension_numbers = #tpu.dot_dimension_numbers<[1], [0], [0], [1], [0, 0, 1, 1], [], []>} : vector<8x64xbf16>, vector<64x256xbf16>, vector<8x256xf32> -> vector<8x256xf32>
    %c0_97 = arith.constant 0 : index
    %c0_98 = arith.constant 0 : index
    %238 = vector.load %arg2[%c0_97, %c0_98] : memref<64x256xbf16, #tpu.memory_space<vmem>>, vector<64x256xbf16>
    %cst_99 = arith.constant dense<0.000000e+00> : vector<8x256xf32>
    %239 = tpu.matmul %235, %238, %cst_99 {dimension_numbers = #tpu.dot_dimension_numbers<[1], [0], [0], [1], [0, 0, 1, 1], [], []>} : vector<8x64xbf16>, vector<64x256xbf16>, vector<8x256xf32> -> vector<8x256xf32>
    %240 = arith.addf %237, %239 : vector<8x256xf32>
    %c0_100 = arith.constant 0 : index
    %c0_101 = arith.constant 0 : index
    %241 = vector.load %arg3[%c0_100, %c0_101] : memref<64x256xbf16, #tpu.memory_space<vmem>>, vector<64x256xbf16>
    %cst_102 = arith.constant dense<0.000000e+00> : vector<8x256xf32>
    %242 = tpu.matmul %232, %241, %cst_102 {dimension_numbers = #tpu.dot_dimension_numbers<[1], [0], [0], [1], [0, 0, 1, 1], [], []>} : vector<8x64xbf16>, vector<64x256xbf16>, vector<8x256xf32> -> vector<8x256xf32>
    %243 = arith.addf %240, %242 : vector<8x256xf32>
    %244 = arith.addf %231, %243 : vector<8x256xf32>
    %245 = vector.extract_strided_slice %244 {offsets = [0, 0], sizes = [8, 192], strides = [1, 1]} : vector<8x256xf32> to vector<8x192xf32>
    %cst_103 = arith.constant 5.000000e-01 : f32
    %246 = vector.broadcast %cst_103 : f32 to vector<8x192xf32>
    %247 = arith.mulf %246, %245 : vector<8x192xf32>
    %248 = math.tanh %247 : vector<8x192xf32>
    %cst_104 = arith.constant 5.000000e-01 : f32
    %249 = vector.broadcast %cst_104 : f32 to vector<8x192xf32>
    %250 = arith.mulf %249, %248 : vector<8x192xf32>
    %cst_105 = arith.constant 5.000000e-01 : f32
    %251 = vector.broadcast %cst_105 : f32 to vector<8x192xf32>
    %252 = arith.addf %250, %251 : vector<8x192xf32>
    %253 = vector.extract_strided_slice %244 {offsets = [0, 192], sizes = [8, 64], strides = [1, 1]} : vector<8x256xf32> to vector<8x64xf32>
    %254 = math.tanh %253 : vector<8x64xf32>
    %255 = vector.extract_strided_slice %252 {offsets = [0, 0], sizes = [8, 64], strides = [1, 1]} : vector<8x192xf32> to vector<8x64xf32>
    %256 = vector.extract_strided_slice %252 {offsets = [0, 64], sizes = [8, 64], strides = [1, 1]} : vector<8x192xf32> to vector<8x64xf32>
    %257 = vector.extract_strided_slice %252 {offsets = [0, 128], sizes = [8, 64], strides = [1, 1]} : vector<8x192xf32> to vector<8x64xf32>
    %258 = arith.mulf %256, %225 : vector<8x64xf32>
    %259 = arith.mulf %255, %254 : vector<8x64xf32>
    %260 = arith.addf %258, %259 : vector<8x64xf32>
    %261 = math.tanh %260 : vector<8x64xf32>
    %262 = arith.mulf %257, %261 : vector<8x64xf32>
    %c7_i32 = arith.constant 7 : i32
    %c8_i32_106 = arith.constant 8 : i32
    %263 = arith.muli %c7_i32, %c8_i32_106 : i32
    %264 = tpu.assume_multiple %263, 8 : i32
    %265 = arith.index_cast %264 : i32 to index
    %c0_107 = arith.constant 0 : index
    %266 = vector.load %arg6[%265, %c0_107] : memref<64x256xf32, #tpu.memory_space<vmem>>, vector<8x256xf32>
    %267 = arith.truncf %262 : vector<8x64xf32> to vector<8x64xbf16>
    %268 = arith.extf %267 : vector<8x64xbf16> to vector<8x64xf32>
    %269 = arith.subf %262, %268 : vector<8x64xf32>
    %270 = arith.truncf %269 : vector<8x64xf32> to vector<8x64xbf16>
    %c0_108 = arith.constant 0 : index
    %c0_109 = arith.constant 0 : index
    %271 = vector.load %arg2[%c0_108, %c0_109] : memref<64x256xbf16, #tpu.memory_space<vmem>>, vector<64x256xbf16>
    %cst_110 = arith.constant dense<0.000000e+00> : vector<8x256xf32>
    %272 = tpu.matmul %267, %271, %cst_110 {dimension_numbers = #tpu.dot_dimension_numbers<[1], [0], [0], [1], [0, 0, 1, 1], [], []>} : vector<8x64xbf16>, vector<64x256xbf16>, vector<8x256xf32> -> vector<8x256xf32>
    %c0_111 = arith.constant 0 : index
    %c0_112 = arith.constant 0 : index
    %273 = vector.load %arg2[%c0_111, %c0_112] : memref<64x256xbf16, #tpu.memory_space<vmem>>, vector<64x256xbf16>
    %cst_113 = arith.constant dense<0.000000e+00> : vector<8x256xf32>
    %274 = tpu.matmul %270, %273, %cst_113 {dimension_numbers = #tpu.dot_dimension_numbers<[1], [0], [0], [1], [0, 0, 1, 1], [], []>} : vector<8x64xbf16>, vector<64x256xbf16>, vector<8x256xf32> -> vector<8x256xf32>
    %275 = arith.addf %272, %274 : vector<8x256xf32>
    %c0_114 = arith.constant 0 : index
    %c0_115 = arith.constant 0 : index
    %276 = vector.load %arg3[%c0_114, %c0_115] : memref<64x256xbf16, #tpu.memory_space<vmem>>, vector<64x256xbf16>
    %cst_116 = arith.constant dense<0.000000e+00> : vector<8x256xf32>
    %277 = tpu.matmul %267, %276, %cst_116 {dimension_numbers = #tpu.dot_dimension_numbers<[1], [0], [0], [1], [0, 0, 1, 1], [], []>} : vector<8x64xbf16>, vector<64x256xbf16>, vector<8x256xf32> -> vector<8x256xf32>
    %278 = arith.addf %275, %277 : vector<8x256xf32>
    %279 = arith.addf %266, %278 : vector<8x256xf32>
    %280 = vector.extract_strided_slice %279 {offsets = [0, 0], sizes = [8, 192], strides = [1, 1]} : vector<8x256xf32> to vector<8x192xf32>
    %cst_117 = arith.constant 5.000000e-01 : f32
    %281 = vector.broadcast %cst_117 : f32 to vector<8x192xf32>
    %282 = arith.mulf %281, %280 : vector<8x192xf32>
    %283 = math.tanh %282 : vector<8x192xf32>
    %cst_118 = arith.constant 5.000000e-01 : f32
    %284 = vector.broadcast %cst_118 : f32 to vector<8x192xf32>
    %285 = arith.mulf %284, %283 : vector<8x192xf32>
    %cst_119 = arith.constant 5.000000e-01 : f32
    %286 = vector.broadcast %cst_119 : f32 to vector<8x192xf32>
    %287 = arith.addf %285, %286 : vector<8x192xf32>
    %288 = vector.extract_strided_slice %279 {offsets = [0, 192], sizes = [8, 64], strides = [1, 1]} : vector<8x256xf32> to vector<8x64xf32>
    %289 = math.tanh %288 : vector<8x64xf32>
    %290 = vector.extract_strided_slice %287 {offsets = [0, 0], sizes = [8, 64], strides = [1, 1]} : vector<8x192xf32> to vector<8x64xf32>
    %291 = vector.extract_strided_slice %287 {offsets = [0, 64], sizes = [8, 64], strides = [1, 1]} : vector<8x192xf32> to vector<8x64xf32>
    %292 = vector.extract_strided_slice %287 {offsets = [0, 128], sizes = [8, 64], strides = [1, 1]} : vector<8x192xf32> to vector<8x64xf32>
    %293 = arith.mulf %291, %260 : vector<8x64xf32>
    %294 = arith.mulf %290, %289 : vector<8x64xf32>
    %295 = arith.addf %293, %294 : vector<8x64xf32>
    %296 = math.tanh %295 : vector<8x64xf32>
    %297 = arith.mulf %292, %296 : vector<8x64xf32>
    %c8_i32_120 = arith.constant 8 : i32
    %c0_121 = arith.constant 0 : index
    %c0_122 = arith.constant 0 : index
    %c0_123 = arith.constant 0 : index
    %298 = vector.load %arg5[%c0_121, %c0_122, %c0_123] : memref<1x8x64xf32, #tpu.memory_space<vmem>>, vector<1x8x64xf32>
    %299 = vector.shape_cast %298 : vector<1x8x64xf32> to vector<8x64xf32>
    %300 = vector.shape_cast %297 : vector<8x64xf32> to vector<1x8x64xf32>
    tpu.vector_store %arg5[%c0_121, %c0_122, %c0_123], %300 {strides = array<i32>} : memref<1x8x64xf32, #tpu.memory_space<vmem>>, vector<1x8x64xf32>,
    return
  }
}

</mosaic_0001>

<bundles_post_ra>
// kernel: fc_encoder_forward.1
= control target key start
LH: loop header
LB: loop body
LE: loop exit
PB: predicated region body
PF: predicated region fallthrough
CT: control target
= control target key end

     0   :  { %v1853_v2 = vmov 0   ;;  %v1854_v6 = vmov 1   ;;  %s2443_s0 = inlined_call_operand.vmem [shape: f32[64,2], index: 0, kind: input, shape index: {}]   ;;  %s2444_s1 = inlined_call_operand.vmem [shape: f32[2,256], index: 1, kind: input, shape index: {}]   ;;  %s2445_s2 = inlined_call_operand.vmem [shape: bf16[64,256], index: 2, kind: input, shape index: {}]   ;;  %s2446_s3 = inlined_call_operand.vmem [shape: bf16[64,256], index: 3, kind: input, shape index: {}]   ;;  %s2447_s4 = inlined_call_operand.vmem [shape: f32[1,256], index: 4, kind: input, shape index: {}]   ;;  %s2448_s5 = inlined_call_operand.hbm [shape: f32[1,8,64], index: 5, kind: output, shape index: {}]  }
   0x1   :  { %v1890_v0 = vld [vmem:[%s2445_s2 + $0x34] ss:$8 sps:$4 sm:$0xff]   ;;  %v1895_v1 = vld [vmem:[%s2445_s2 + $0x30] ss:$8 sps:$4 sm:$0xff]   ;;  %308 = vmatprep.mubr.bf16.mxu0 %v1853_v2  ;;  %349 = vmatprep.mubr.bf16.mxu1 %v1853_v2  ;;  %v1904_v3 = vld [vmem:[%s2445_s2 + $0x24] ss:$8 sps:$4 sm:$0xff]  }
   0x2   :  { %284 = vmatprep.subr.bf16.mxu0 %v1890_v0  ;;  %325 = vmatprep.subr.bf16.mxu1 %v1890_v0  ;;  %v1911_v4 = vld [vmem:[%s2445_s2 + $0x20] ss:$8 sps:$4 sm:$0xff]   ;;  %v1918_v5 = vld [vmem:[%s2445_s2 + $0x14] ss:$8 sps:$4 sm:$0xff]   ;;  %v1927_v7 = vld [vmem:[%s2445_s2 + $0x10] ss:$8 sps:$4 sm:$0xff]  }
   0x3   :  { %285 = vmatpush1.bf16.msra.mxu0 %v1895_v1  ;;  %326 = vmatpush1.bf16.msra.mxu1 %v1895_v1  ;;  %v1934_v8 = vld [vmem:[%s2445_s2 + $0x4] ss:$8 sps:$4 sm:$0xff]   ;;  %v1944_v10 = vld [vmem:[%s2445_s2] ss:$8 sps:$4 sm:$0xff]  }
   0x4   :  { %286 = vmatprep.subr.bf16.mxu0 %v1904_v3  ;;  %327 = vmatprep.subr.bf16.mxu1 %v1904_v3  ;;  %v22_v9 = vld [vmem:[%s2443_s0] sm:$0xff] }
   0x5   :  { %1717 = vset.pattern.permute.xlu0 %v1853_v2  ;;  %1720 = vset.pattern.permute.xlu1 %v1854_v6 }
   0x7   :  { %287 = vmatpush1.bf16.msra.mxu0 %v1911_v4  ;;  %328 = vmatpush1.bf16.msra.mxu1 %v1911_v4 }
   0x8   :  { %288 = vmatprep.subr.bf16.mxu0 %v1918_v5  ;;  %329 = vmatprep.subr.bf16.mxu1 %v1918_v5 }
   0xb   :  { %289 = vmatpush1.bf16.msra.mxu0 %v1927_v7  ;;  %330 = vmatpush1.bf16.msra.mxu1 %v1927_v7 }
   0xc   :  { %10 = vsyncpa [#allocation4], 0  ;;  %290 = vmatprep.subr.bf16.mxu0 %v1934_v8  ;;  %331 = vmatprep.subr.bf16.mxu1 %v1934_v8  ;;  %v1951_v11 = vld [vmem:[%s2446_s3 + $0x34] ss:$8 sps:$4 sm:$0xff]   ;;  %v1958_v12 = vld [vmem:[%s2446_s3 + $0x30] ss:$8 sps:$4 sm:$0xff]   ;;  %v72_v19 = vlaneseq }
   0xd   :  { %33 = vperm.xlu0 %1717, %v22_v9   ;;  %v1964_v13 = vld [vmem:[%s2446_s3 + $0x24] ss:$8 sps:$4 sm:$0xff]   ;;  %v1974_v14 = vld [vmem:[%s2446_s3 + $0x20] ss:$8 sps:$4 sm:$0xff]   ;;  %v1981_v15 = vld [vmem:[%s2446_s3 + $0x14] ss:$8 sps:$4 sm:$0xff]  }
   0xe   :  { %v1990_v16 = vld [vmem:[%s2446_s3 + $0x10] ss:$8 sps:$4 sm:$0xff]   ;;  %v1996_v17 = vld [vmem:[%s2446_s3 + $0x4] ss:$8 sps:$4 sm:$0xff]   ;;  %v2005_v18 = vld [vmem:[%s2446_s3] ss:$8 sps:$4 sm:$0xff]  }
   0xf   :  { %291 = vmatpush1.bf16.msra.mxu0 %v1944_v10  ;;  %332 = vmatpush1.bf16.msra.mxu1 %v1944_v10  ;;  %v73_v20 = vshrl.u32 %v72_v19, 7  ;;  %v30_v21 = vld [vmem:[%s2444_s1] ss:$2 sm:$0x3]  ;;  %vm272_vm0 = vcmask 523264  }
  0x10   :  { %414 = vmatprep.subr.bf16.mxu0 %v1951_v11  ;;  %497 = vmatprep.subr.bf16.mxu1 %v1890_v0  ;;  %v1675_v23 = vld [vmem:[%s2444_s1 + $0x1] ss:$2 sm:$0x3]  ;;  %s1855_s1 = smov 64  }
  0x11   :  { %1718 = vset.pattern.permute.xlu0 %v1854_v6  ;;  %v74_v22 = vsub.s32 0, %v73_v20  ;;  %v175_v24 = vld [vmem:[%s2447_s4] sm:$0x3]  ;;  %v78_v34 = vsub.s32 1, %v73_v20 }
  0x12   :  { %309 = vmatmul.mubr.bf16.vlgmr.msra.gmra.mxu0 %v1853_v2  ;;  %350 = vmatmul.mubr.bf16.vlgmr.msra.gmra.mxu1 %v1853_v2 }
  0x13   :  { %415 = vmatpush1.bf16.msra.mxu0 %v1958_v12  ;;  %438 = vmatprep.mubr.bf16.mxu0 %v1853_v2  ;;  %v2033_v25 = vrot.slane %v30_v21, %v74_v22  ;;  %v2035_v26 = vrot.slane %v1675_v23, %v74_v22  ;;  %v2037_v27 = vrot.slane %v175_v24, %v74_v22 }
  0x14   :  { %416 = vmatprep.subr.bf16.mxu0 %v1964_v13  ;;  %101 = vperm.xlu0 %1718, %v22_v9   ;;  %v2039_v40 = vrot.slane %v30_v21, %v78_v34  ;;  %v2041_v41 = vrot.slane %v1675_v23, %v78_v34  ;;  %v2047_v48 = vrot.slane %v175_v24, %v78_v34 }
  0x15   :  { %498 = vmatpush1.bf16.msra.mxu1 %v1895_v1  ;;  %521 = vmatprep.mubr.bf16.mxu1 %v1853_v2 }
  0x16   :  { %499 = vmatprep.subr.bf16.mxu1 %v1904_v3 }
  0x17   :  { %417 = vmatpush1.bf16.msra.mxu0 %v1974_v14 }
  0x18   :  { %418 = vmatprep.subr.bf16.mxu0 %v1981_v15  ;;  %1719 = vset.pattern.permute.xlu0 %v1853_v2 }
  0x19   :  { %500 = vmatpush1.bf16.msra.mxu1 %v1911_v4 }
  0x1a   :  { %501 = vmatprep.subr.bf16.mxu1 %v1918_v5 }
  0x1b   :  { %419 = vmatpush1.bf16.msra.mxu0 %v1990_v16 }
  0x1c   :  { %420 = vmatprep.subr.bf16.mxu0 %v1996_v17 }
  0x1d   :  { %502 = vmatpush1.bf16.msra.mxu1 %v1927_v7 }
  0x1e   :  { %503 = vmatprep.subr.bf16.mxu1 %v1934_v8 }
  0x1f   :  { %421 = vmatpush1.bf16.msra.mxu0 %v2005_v18 }
  0x20   :  { %541 = vmatprep.subr.bf16.mxu0 %v1890_v0 }
  0x21   :  { %504 = vmatpush1.bf16.msra.mxu1 %v1944_v10 }
  0x22   :  { %439 = vmatmul.mubr.bf16.vlgmr.msra.gmra.mxu0 %v1853_v2  ;;  %582 = vmatprep.subr.bf16.mxu1 %v1951_v11 }
  0x23   :  { %542 = vmatpush1.bf16.msra.mxu0 %v1895_v1  ;;  %565 = vmatprep.mubr.bf16.mxu0 %v1853_v2 }
  0x24   :  { %543 = vmatprep.subr.bf16.mxu0 %v1904_v3 }
  0x27   :  { %544 = vmatpush1.bf16.msra.mxu0 %v1911_v4 }
  0x28   :  { %545 = vmatprep.subr.bf16.mxu0 %v1918_v5 }
  0x2b   :  { %546 = vmatpush1.bf16.msra.mxu0 %v1927_v7 }
  0x2c   :  { %547 = vmatprep.subr.bf16.mxu0 %v1934_v8 }
  0x2f   :  { %548 = vmatpush1.bf16.msra.mxu0 %v1944_v10 }
  0x30   :  { %665 = vmatprep.subr.bf16.mxu0 %v1890_v0 }
  0x88   :  { %v34_v28 = vpop.permute.xlu0 %33 }
  0x89   :  { %v82_v42 = vmul.f32 %v2033_v25, %v34_v28  ;;  %v83_v44 = vmul.f32 %v2039_v40, %v34_v28  ;;  %v23_v28 = vld [vmem:[%s2443_s0 + $0x8] sm:$0xff] }
  0x8a   :  { %38 = vperm.xlu0 %1719, %v23_v28  }
  0x8f   :  { %v102_v37 = vpop.permute.xlu0 %101 }
  0x90   :  { %v143_v43 = vmul.f32 %v2035_v26, %v102_v37  ;;  %v144_v45 = vmul.f32 %v2041_v41, %v102_v37 }
  0x92   :  { %v159_v46 = vadd.f32 %v143_v43, %v82_v42  ;;  %v160_v47 = vadd.f32 %v144_v45, %v83_v44 }
  0x94   :  { %v187_v51 = vadd.f32 %v2037_v27, %v159_v46  ;;  %v188_v55 = vadd.f32 %v2047_v48, %v160_v47 }
  0xd2   :  { %v310_v29 = vpop.f32.mrf.mxu0  ;;  %v351_v30 = vpop.f32.mrf.mxu1 }
  0xd3   :  { %v352_v31 = vadd.f32 %v351_v30, %v310_v29 }
  0xd4   :  { %v312_v32 = vpop.f32.mrf.mxu0  ;;  %v353_v33 = vpop.f32.mrf.mxu1 }
  0xd5   :  { %v354_v50 = vadd.f32 %v353_v33, %v312_v32 }
  0xd6   :  { %v314_v35 = vpop.f32.mrf.mxu0  ;;  %v355_v36 = vpop.f32.mrf.mxu1 }
  0xd8   :  { %v315_v38 = vpop.f32.mrf.mxu0  ;;  %v356_v39 = vpop.f32.mrf.mxu1 }
  0xe2   :  { %v440_v49 = vpop.f32.mrf.mxu0 }
  0xe3   :  { %v447_v52 = vadd.f32 %v440_v49, %v352_v31 }
  0xe4   :  { %v442_v53 = vpop.f32.mrf.mxu0 }
  0xe5   :  { %v449_v54 = vadd.f32 %v447_v52, %v187_v51  ;;  %v448_v56 = vadd.f32 %v442_v53, %v354_v50 }
  0xe6   :  { %v444_v57 = vpop.f32.mrf.mxu0 }
  0xe7   :  { %v450_v58 = vadd.f32 %v448_v56, %v188_v55  ;;  %v451_v61 = vmul.f32 0.5, %v449_v54 }
  0xe8   :  { %v445_v59 = vpop.f32.mrf.mxu0 }
  0xe9   :  { %1751 = vtanh.f32 %v450_v58  ;;  %v452_v29 = vmul.f32 0.5, %v450_v58 }
  0xea   :  { %1753 = vtanh.f32 %v451_v61 }
  0xf6   :  { %v1752_v60 = vpop.eup %1751 }
  0xf7   :  { %462 = vrot.lane.b32.xlu1 %v1752_v60, %s1855_s1  ;;  %v1754_v62 = vpop.eup %1753 }
  0xf8   :  { %v455_v63 = vmul.f32 0.5, %v1754_v62 }
  0xfa   :  { %v457_v9 = vadd.f32 0.5, %v455_v63 }
  0xfc   :  { %v460_v21 = vmul.f32 0.0, %v457_v9 }
 0x105   :  { %v39_v52 = vpop.permute.xlu0 %38 }
 0x106   :  { %v85_v54 = vmul.f32 %v2039_v40, %v39_v52 }
 0x169   :  { %v463_v19 = vpop.permute.xlu1 %462 }
 0x16a   :  { %v465_v20 = vmul.f32 %v463_v19, %v457_v9 }
 0x16c   :  { %467 = vrot.lane.b32.xlu1 %v465_v20, %s1855_s1 }
 0x1de   :  { %v468_v22 = vpop.permute.xlu1 %467 }
 0x1df   :  { %v2053_v23 = vadd.f32 %v468_v22, %v460_v21  ;;  %v84_v21 = vmul.f32 %v2033_v25, %v39_v52 }
 0x1e1   :  { %1755 = vtanh.f32 %v2053_v23 }
 0x1e2   :  { %1757 = vtanh.f32 %v452_v29 }
 0x1ee   :  { %v1756_v24 = vpop.eup %1755 }
 0x1ef   :  { %473 = vrot.lane.b32.xlu1 %v1756_v24, %s1855_s1  ;;  %v1758_v30 = vpop.eup %1757 }
 0x1f0   :  { %v456_v31 = vmul.f32 0.5, %v1758_v30 }
 0x1f2   :  { %v458_v32 = vadd.f32 0.5, %v456_v31 }
 0x1f3   :  { %105 = vperm.xlu1 %1720, %v23_v28  }
 0x261   :  { %v474_v33 = vpop.permute.xlu1 %473 }
 0x262   :  { %v476_v34 = vmul.f32 %v474_v33, %v458_v32 }
 0x264   :  { %v482_v35 = vpack.c.bf16 %v476_v34, %v476_v34 }
 0x266   :  { %v483_v36 = vunpack.c.l.bf16 %v482_v35  ;;  %1693 = vmatmul.mubr.msk.bf16.vlgmr.msra.gmra.mxu0 %vm272_vm0, %v482_v35 }
 0x267   :  { %666 = vmatpush1.bf16.msra.mxu0 %v1895_v1  ;;  %689 = vmatprep.mubr.bf16.mxu0 %v1853_v2 }
 0x268   :  { %v484_v37 = vsub.f32 %v476_v34, %v483_v36  ;;  %667 = vmatprep.subr.bf16.mxu0 %v1904_v3 }
 0x26a   :  { %v485_v38 = vpack.c.bf16 %v484_v37, %v484_v37 }
 0x26b   :  { %668 = vmatpush1.bf16.msra.mxu0 %v1911_v4 }
 0x26c   :  { %1692 = vmatmul.mubr.msk.bf16.vlgmr.msra.gmra.mxu1 %vm272_vm0, %v485_v38  ;;  %669 = vmatprep.subr.bf16.mxu0 %v1918_v5 }
 0x26d   :  { %583 = vmatpush1.bf16.msra.mxu1 %v1958_v12  ;;  %606 = vmatprep.mubr.bf16.mxu1 %v1853_v2 }
 0x26e   :  { %584 = vmatprep.subr.bf16.mxu1 %v1964_v13  ;;  %v106_v51 = vpop.permute.xlu1 %105 }
 0x26f   :  { %670 = vmatpush1.bf16.msra.mxu0 %v1927_v7  ;;  %v146_v53 = vmul.f32 %v2041_v41, %v106_v51  ;;  %v145_v20 = vmul.f32 %v2035_v26, %v106_v51 }
 0x270   :  { %671 = vmatprep.subr.bf16.mxu0 %v1934_v8 }
 0x271   :  { %585 = vmatpush1.bf16.msra.mxu1 %v1974_v14  ;;  %v162_v55 = vadd.f32 %v146_v53, %v85_v54  ;;  %v161_v22 = vadd.f32 %v145_v20, %v84_v21 }
 0x272   :  { %586 = vmatprep.subr.bf16.mxu1 %v1981_v15 }
 0x273   :  { %672 = vmatpush1.bf16.msra.mxu0 %v1944_v10  ;;  %v190_v59 = vadd.f32 %v2047_v48, %v162_v55  ;;  %v189_v24 = vadd.f32 %v2037_v27, %v161_v22 }
 0x274   :  { %750 = vmatprep.subr.bf16.mxu0 %v1951_v11 }
 0x275   :  { %587 = vmatpush1.bf16.msra.mxu1 %v1990_v16 }
 0x276   :  { %588 = vmatprep.subr.bf16.mxu1 %v1996_v17 }
 0x279   :  { %589 = vmatpush1.bf16.msra.mxu1 %v2005_v18 }
 0x27a   :  { %709 = vmatprep.subr.bf16.mxu1 %v1890_v0 }
 0x27c   :  { %1694 = vmatmul.mubr.msk.bf16.vlgmr.msra.gmra.mxu1 %vm272_vm0, %v482_v35  ;;  %v24_v35 = vld [vmem:[%s2443_s0 + $0x10] sm:$0xff] }
 0x27d   :  { %710 = vmatpush1.bf16.msra.mxu1 %v1895_v1  ;;  %733 = vmatprep.mubr.bf16.mxu1 %v1853_v2 }
 0x27e   :  { %711 = vmatprep.subr.bf16.mxu1 %v1904_v3 }
 0x281   :  { %712 = vmatpush1.bf16.msra.mxu1 %v1911_v4 }
 0x282   :  { %713 = vmatprep.subr.bf16.mxu1 %v1918_v5 }
 0x285   :  { %714 = vmatpush1.bf16.msra.mxu1 %v1927_v7 }
 0x286   :  { %715 = vmatprep.subr.bf16.mxu1 %v1934_v8 }
 0x289   :  { %716 = vmatpush1.bf16.msra.mxu1 %v1944_v10 }
 0x28a   :  { %833 = vmatprep.subr.bf16.mxu1 %v1890_v0 }
 0x326   :  { %v567_v39 = vpop.f32.mrf.mxu0 }
 0x328   :  { %v569_v42 = vpop.f32.mrf.mxu0 }
 0x32a   :  { %v571_v43 = vpop.f32.mrf.mxu0 }
 0x32c   :  { %v523_v44 = vpop.f32.mrf.mxu1  ;;  %v572_v45 = vpop.f32.mrf.mxu0 }
 0x32d   :  { %v568_v46 = vadd.f32 %v567_v39, %v523_v44 }
 0x32e   :  { %v525_v47 = vpop.f32.mrf.mxu1 }
 0x32f   :  { %v570_v57 = vadd.f32 %v569_v42, %v525_v47 }
 0x330   :  { %v527_v49 = vpop.f32.mrf.mxu1 }
 0x332   :  { %v528_v50 = vpop.f32.mrf.mxu1 }
 0x33c   :  { %v608_v56 = vpop.f32.mrf.mxu1 }
 0x33d   :  { %v615_v58 = vadd.f32 %v608_v56, %v568_v46 }
 0x33e   :  { %v610_v60 = vpop.f32.mrf.mxu1 }
 0x33f   :  { %v616_v61 = vadd.f32 %v610_v60, %v570_v57  ;;  %v617_v28 = vadd.f32 %v615_v58, %v189_v24 }
 0x340   :  { %v612_v62 = vpop.f32.mrf.mxu1 }
 0x341   :  { %v618_v63 = vadd.f32 %v616_v61, %v190_v59  ;;  %v619_v29 = vmul.f32 0.5, %v617_v28 }
 0x342   :  { %v613_v9 = vpop.f32.mrf.mxu1 }
 0x343   :  { %1759 = vtanh.f32 %v618_v63  ;;  %v620_v42 = vmul.f32 0.5, %v618_v63 }
 0x344   :  { %1761 = vtanh.f32 %v619_v29 }
 0x350   :  { %v1760_v19 = vpop.eup %1759 }
 0x351   :  { %630 = vrot.lane.b32.xlu1 %v1760_v19, %s1855_s1  ;;  %v1762_v30 = vpop.eup %1761 }
 0x352   :  { %v623_v31 = vmul.f32 0.5, %v1762_v30 }
 0x354   :  { %v625_v32 = vadd.f32 0.5, %v623_v31 }
 0x356   :  { %v628_v36 = vmul.f32 %v625_v32, %v2053_v23 }
 0x3c3   :  { %v631_v33 = vpop.permute.xlu1 %630 }
 0x3c4   :  { %v633_v34 = vmul.f32 %v631_v33, %v625_v32 }
 0x3c6   :  { %635 = vrot.lane.b32.xlu0 %v633_v34, %s1855_s1 }
 0x3ca   :  { %43 = vperm.xlu0 %1719, %v24_v35  }
 0x3ce   :  { %1722 = vset.pattern.permute.xlu0 %v1854_v6 }
 0x438   :  { %v636_v37 = vpop.permute.xlu0 %635 }
 0x439   :  { %v2103_v38 = vadd.f32 %v636_v37, %v628_v36 }
 0x43b   :  { %1763 = vtanh.f32 %v2103_v38 }
 0x43c   :  { %1765 = vtanh.f32 %v620_v42 }
 0x445   :  { %v44_v62 = vpop.permute.xlu0 %43 }
 0x446   :  { %v87_v9 = vmul.f32 %v2039_v40, %v44_v62 }
 0x448   :  { %v1764_v39 = vpop.eup %1763 }
 0x449   :  { %641 = vrot.lane.b32.xlu1 %v1764_v39, %s1855_s1  ;;  %v1766_v43 = vpop.eup %1765 }
 0x44a   :  { %v624_v44 = vmul.f32 0.5, %v1766_v43 }
 0x44c   :  { %v626_v45 = vadd.f32 0.5, %v624_v44 }
 0x44d   :  { %109 = vperm.xlu1 %1720, %v24_v35   ;;  %v86_v35 = vmul.f32 %v2033_v25, %v44_v62 }
 0x451   :  { %1721 = vset.pattern.permute.xlu1 %v1853_v2 }
 0x4bb   :  { %v642_v46 = vpop.permute.xlu1 %641 }
 0x4bc   :  { %v644_v47 = vmul.f32 %v642_v46, %v626_v45 }
 0x4be   :  { %v650_v49 = vpack.c.bf16 %v644_v47, %v644_v47 }
 0x4c0   :  { %v651_v23 = vunpack.c.l.bf16 %v650_v49  ;;  %1696 = vmatmul.mubr.msk.bf16.vlgmr.msra.gmra.mxu1 %vm272_vm0, %v650_v49 }
 0x4c1   :  { %834 = vmatpush1.bf16.msra.mxu1 %v1895_v1  ;;  %857 = vmatprep.mubr.bf16.mxu1 %v1853_v2 }
 0x4c2   :  { %v652_v50 = vsub.f32 %v644_v47, %v651_v23  ;;  %835 = vmatprep.subr.bf16.mxu1 %v1904_v3 }
 0x4c4   :  { %v653_v51 = vpack.c.bf16 %v652_v50, %v652_v50 }
 0x4c5   :  { %836 = vmatpush1.bf16.msra.mxu1 %v1911_v4 }
 0x4c6   :  { %1695 = vmatmul.mubr.msk.bf16.vlgmr.msra.gmra.mxu0 %vm272_vm0, %v653_v51  ;;  %837 = vmatprep.subr.bf16.mxu1 %v1918_v5 }
 0x4c7   :  { %751 = vmatpush1.bf16.msra.mxu0 %v1958_v12  ;;  %774 = vmatprep.mubr.bf16.mxu0 %v1853_v2 }
 0x4c8   :  { %752 = vmatprep.subr.bf16.mxu0 %v1964_v13  ;;  %v110_v61 = vpop.permute.xlu1 %109 }
 0x4c9   :  { %838 = vmatpush1.bf16.msra.mxu1 %v1927_v7  ;;  %v148_v63 = vmul.f32 %v2041_v41, %v110_v61  ;;  %v147_v34 = vmul.f32 %v2035_v26, %v110_v61 }
 0x4ca   :  { %839 = vmatprep.subr.bf16.mxu1 %v1934_v8 }
 0x4cb   :  { %753 = vmatpush1.bf16.msra.mxu0 %v1974_v14  ;;  %v164_v19 = vadd.f32 %v148_v63, %v87_v9  ;;  %v163_v36 = vadd.f32 %v147_v34, %v86_v35 }
 0x4cc   :  { %754 = vmatprep.subr.bf16.mxu0 %v1981_v15 }
 0x4cd   :  { %840 = vmatpush1.bf16.msra.mxu1 %v1944_v10  ;;  %v192_v28 = vadd.f32 %v2047_v48, %v164_v19  ;;  %v191_v37 = vadd.f32 %v2037_v27, %v163_v36 }
 0x4ce   :  { %918 = vmatprep.subr.bf16.mxu1 %v1951_v11 }
 0x4cf   :  { %755 = vmatpush1.bf16.msra.mxu0 %v1990_v16 }
 0x4d0   :  { %756 = vmatprep.subr.bf16.mxu0 %v1996_v17 }
 0x4d3   :  { %757 = vmatpush1.bf16.msra.mxu0 %v2005_v18 }
 0x4d4   :  { %877 = vmatprep.subr.bf16.mxu0 %v1890_v0 }
 0x4d6   :  { %1697 = vmatmul.mubr.msk.bf16.vlgmr.msra.gmra.mxu0 %vm272_vm0, %v650_v49 }
 0x4d7   :  { %878 = vmatpush1.bf16.msra.mxu0 %v1895_v1  ;;  %901 = vmatprep.mubr.bf16.mxu0 %v1853_v2 }
 0x4d8   :  { %879 = vmatprep.subr.bf16.mxu0 %v1904_v3 }
 0x4db   :  { %880 = vmatpush1.bf16.msra.mxu0 %v1911_v4 }
 0x4dc   :  { %881 = vmatprep.subr.bf16.mxu0 %v1918_v5 }
 0x4df   :  { %882 = vmatpush1.bf16.msra.mxu0 %v1927_v7 }
 0x4e0   :  { %883 = vmatprep.subr.bf16.mxu0 %v1934_v8 }
 0x4e3   :  { %884 = vmatpush1.bf16.msra.mxu0 %v1944_v10 }
 0x4e4   :  { %1001 = vmatprep.subr.bf16.mxu0 %v1890_v0 }
 0x580   :  { %v735_v52 = vpop.f32.mrf.mxu1 }
 0x582   :  { %v737_v53 = vpop.f32.mrf.mxu1 }
 0x584   :  { %v739_v54 = vpop.f32.mrf.mxu1 }
 0x586   :  { %v691_v55 = vpop.f32.mrf.mxu0  ;;  %v740_v56 = vpop.f32.mrf.mxu1 }
 0x587   :  { %v736_v57 = vadd.f32 %v735_v52, %v691_v55  ;;  %v25_v52 = vld [vmem:[%s2443_s0 + $0x18] sm:$0xff] }
 0x588   :  { %v693_v58 = vpop.f32.mrf.mxu0 }
 0x589   :  { %v738_v21 = vadd.f32 %v737_v53, %v693_v58 }
 0x58a   :  { %v695_v59 = vpop.f32.mrf.mxu0 }
 0x58c   :  { %v696_v60 = vpop.f32.mrf.mxu0 }
 0x596   :  { %v776_v20 = vpop.f32.mrf.mxu0 }
 0x597   :  { %v783_v22 = vadd.f32 %v776_v20, %v736_v57 }
 0x598   :  { %v778_v24 = vpop.f32.mrf.mxu0 }
 0x599   :  { %v784_v29 = vadd.f32 %v778_v24, %v738_v21  ;;  %v785_v39 = vadd.f32 %v783_v22, %v191_v37 }
 0x59a   :  { %v780_v30 = vpop.f32.mrf.mxu0 }
 0x59b   :  { %v786_v31 = vadd.f32 %v784_v29, %v192_v28  ;;  %v787_v42 = vmul.f32 0.5, %v785_v39 }
 0x59c   :  { %v781_v32 = vpop.f32.mrf.mxu0 }
 0x59d   :  { %1767 = vtanh.f32 %v786_v31  ;;  %v788_v53 = vmul.f32 0.5, %v786_v31 }
 0x59e   :  { %1769 = vtanh.f32 %v787_v42 }
 0x5aa   :  { %v1768_v33 = vpop.eup %1767 }
 0x5ab   :  { %798 = vrot.lane.b32.xlu0 %v1768_v33, %s1855_s1  ;;  %v1770_v43 = vpop.eup %1769 }
 0x5ac   :  { %v791_v44 = vmul.f32 0.5, %v1770_v43 }
 0x5ae   :  { %v793_v45 = vadd.f32 0.5, %v791_v44 }
 0x5b0   :  { %v796_v49 = vmul.f32 %v793_v45, %v2103_v38 }
 0x61d   :  { %v799_v46 = vpop.permute.xlu0 %798 }
 0x61e   :  { %v801_v47 = vmul.f32 %v799_v46, %v793_v45 }
 0x620   :  { %803 = vrot.lane.b32.xlu1 %v801_v47, %s1855_s1 }
 0x624   :  { %48 = vperm.xlu1 %1721, %v25_v52  }
 0x692   :  { %v804_v23 = vpop.permute.xlu1 %803 }
 0x693   :  { %v2147_v50 = vadd.f32 %v804_v23, %v796_v49 }
 0x695   :  { %1771 = vtanh.f32 %v2147_v50 }
 0x696   :  { %1773 = vtanh.f32 %v788_v53 }
 0x69f   :  { %v49_v29 = vpop.permute.xlu1 %48 }
 0x6a0   :  { %v89_v31 = vmul.f32 %v2039_v40, %v49_v29  ;;  %v88_v47 = vmul.f32 %v2033_v25, %v49_v29 }
 0x6a2   :  { %v1772_v51 = vpop.eup %1771 }
 0x6a3   :  { %809 = vrot.lane.b32.xlu0 %v1772_v51, %s1855_s1  ;;  %v1774_v54 = vpop.eup %1773 }
 0x6a4   :  { %v792_v55 = vmul.f32 0.5, %v1774_v54 }
 0x6a6   :  { %v794_v56 = vadd.f32 0.5, %v792_v55 }
 0x6a7   :  { %113 = vperm.xlu0 %1722, %v25_v52  }
 0x715   :  { %v810_v38 = vpop.permute.xlu0 %809 }
 0x716   :  { %v812_v57 = vmul.f32 %v810_v38, %v794_v56 }
 0x718   :  { %v818_v58 = vpack.c.bf16 %v812_v57, %v812_v57 }
 0x71a   :  { %v819_v59 = vunpack.c.l.bf16 %v818_v58  ;;  %1699 = vmatmul.mubr.msk.bf16.vlgmr.msra.gmra.mxu0 %vm272_vm0, %v818_v58 }
 0x71b   :  { %1002 = vmatpush1.bf16.msra.mxu0 %v1895_v1  ;;  %1025 = vmatprep.mubr.bf16.mxu0 %v1853_v2 }
 0x71c   :  { %v820_v60 = vsub.f32 %v812_v57, %v819_v59  ;;  %1003 = vmatprep.subr.bf16.mxu0 %v1904_v3 }
 0x71e   :  { %v821_v61 = vpack.c.bf16 %v820_v60, %v820_v60 }
 0x71f   :  { %1004 = vmatpush1.bf16.msra.mxu0 %v1911_v4 }
 0x720   :  { %1698 = vmatmul.mubr.msk.bf16.vlgmr.msra.gmra.mxu1 %vm272_vm0, %v821_v61  ;;  %1005 = vmatprep.subr.bf16.mxu0 %v1918_v5 }
 0x721   :  { %919 = vmatpush1.bf16.msra.mxu1 %v1958_v12  ;;  %942 = vmatprep.mubr.bf16.mxu1 %v1853_v2 }
 0x722   :  { %920 = vmatprep.subr.bf16.mxu1 %v1964_v13  ;;  %v114_v30 = vpop.permute.xlu0 %113 }
 0x723   :  { %1006 = vmatpush1.bf16.msra.mxu0 %v1927_v7  ;;  %v150_v32 = vmul.f32 %v2041_v41, %v114_v30  ;;  %v149_v49 = vmul.f32 %v2035_v26, %v114_v30 }
 0x724   :  { %1007 = vmatprep.subr.bf16.mxu0 %v1934_v8 }
 0x725   :  { %921 = vmatpush1.bf16.msra.mxu1 %v1974_v14  ;;  %v166_v33 = vadd.f32 %v150_v32, %v89_v31  ;;  %v165_v23 = vadd.f32 %v149_v49, %v88_v47 }
 0x726   :  { %922 = vmatprep.subr.bf16.mxu1 %v1981_v15 }
 0x727   :  { %1008 = vmatpush1.bf16.msra.mxu0 %v1944_v10  ;;  %v194_v37 = vadd.f32 %v2047_v48, %v166_v33  ;;  %v193_v51 = vadd.f32 %v2037_v27, %v165_v23 }
 0x728   :  { %1086 = vmatprep.subr.bf16.mxu0 %v1951_v11 }
 0x729   :  { %923 = vmatpush1.bf16.msra.mxu1 %v1990_v16 }
 0x72a   :  { %924 = vmatprep.subr.bf16.mxu1 %v1996_v17 }
 0x72d   :  { %925 = vmatpush1.bf16.msra.mxu1 %v2005_v18 }
 0x72e   :  { %1045 = vmatprep.subr.bf16.mxu1 %v1890_v0 }
 0x730   :  { %1700 = vmatmul.mubr.msk.bf16.vlgmr.msra.gmra.mxu1 %vm272_vm0, %v818_v58  ;;  %v26_v58 = vld [vmem:[%s2443_s0 + $0x20] sm:$0xff] }
 0x731   :  { %1046 = vmatpush1.bf16.msra.mxu1 %v1895_v1  ;;  %1069 = vmatprep.mubr.bf16.mxu1 %v1853_v2 }
 0x732   :  { %1047 = vmatprep.subr.bf16.mxu1 %v1904_v3 }
 0x735   :  { %1048 = vmatpush1.bf16.msra.mxu1 %v1911_v4 }
 0x736   :  { %1049 = vmatprep.subr.bf16.mxu1 %v1918_v5 }
 0x739   :  { %1050 = vmatpush1.bf16.msra.mxu1 %v1927_v7 }
 0x73a   :  { %1051 = vmatprep.subr.bf16.mxu1 %v1934_v8 }
 0x73d   :  { %1052 = vmatpush1.bf16.msra.mxu1 %v1944_v10 }
 0x73e   :  { %1169 = vmatprep.subr.bf16.mxu1 %v1890_v0 }
 0x7da   :  { %v903_v62 = vpop.f32.mrf.mxu0 }
 0x7dc   :  { %v905_v63 = vpop.f32.mrf.mxu0 }
 0x7de   :  { %v907_v9 = vpop.f32.mrf.mxu0 }
 0x7e0   :  { %v859_v19 = vpop.f32.mrf.mxu1  ;;  %v908_v20 = vpop.f32.mrf.mxu0 }
 0x7e1   :  { %v904_v21 = vadd.f32 %v903_v62, %v859_v19 }
 0x7e2   :  { %v861_v22 = vpop.f32.mrf.mxu1 }
 0x7e3   :  { %v906_v35 = vadd.f32 %v905_v63, %v861_v22 }
 0x7e4   :  { %v863_v24 = vpop.f32.mrf.mxu1 }
 0x7e6   :  { %v864_v28 = vpop.f32.mrf.mxu1 }
 0x7f0   :  { %v944_v34 = vpop.f32.mrf.mxu1 }
 0x7f1   :  { %v951_v36 = vadd.f32 %v944_v34, %v904_v21 }
 0x7f2   :  { %v946_v39 = vpop.f32.mrf.mxu1 }
 0x7f3   :  { %v952_v42 = vadd.f32 %v946_v39, %v906_v35  ;;  %v953_v52 = vadd.f32 %v951_v36, %v193_v51 }
 0x7f4   :  { %v948_v43 = vpop.f32.mrf.mxu1 }
 0x7f5   :  { %v954_v44 = vadd.f32 %v952_v42, %v194_v37  ;;  %v955_v53 = vmul.f32 0.5, %v953_v52 }
 0x7f6   :  { %v949_v45 = vpop.f32.mrf.mxu1 }
 0x7f7   :  { %1775 = vtanh.f32 %v954_v44  ;;  %v956_v63 = vmul.f32 0.5, %v954_v44 }
 0x7f8   :  { %1777 = vtanh.f32 %v955_v53 }
 0x804   :  { %v1776_v46 = vpop.eup %1775 }
 0x805   :  { %966 = vrot.lane.b32.xlu1 %v1776_v46, %s1855_s1  ;;  %v1778_v54 = vpop.eup %1777 }
 0x806   :  { %v959_v55 = vmul.f32 0.5, %v1778_v54 }
 0x808   :  { %v961_v56 = vadd.f32 0.5, %v959_v55 }
 0x80a   :  { %v964_v59 = vmul.f32 %v961_v56, %v2147_v50 }
 0x877   :  { %v967_v38 = vpop.permute.xlu1 %966 }
 0x878   :  { %v969_v57 = vmul.f32 %v967_v38, %v961_v56 }
 0x87a   :  { %971 = vrot.lane.b32.xlu1 %v969_v57, %s1855_s1 }
 0x87e   :  { %53 = vperm.xlu1 %1721, %v26_v58  }
 0x882   :  { %1724 = vset.pattern.permute.xlu1 %v1854_v6 }
 0x8ec   :  { %v972_v60 = vpop.permute.xlu1 %971 }
 0x8ed   :  { %v2197_v61 = vadd.f32 %v972_v60, %v964_v59 }
 0x8ef   :  { %1779 = vtanh.f32 %v2197_v61 }
 0x8f0   :  { %1781 = vtanh.f32 %v956_v63 }
 0x8f9   :  { %v54_v37 = vpop.permute.xlu1 %53 }
 0x8fa   :  { %v91_v39 = vmul.f32 %v2039_v40, %v54_v37  ;;  %v90_v54 = vmul.f32 %v2033_v25, %v54_v37 }
 0x8fc   :  { %v1780_v62 = vpop.eup %1779 }
 0x8fd   :  { %977 = vrot.lane.b32.xlu0 %v1780_v62, %s1855_s1  ;;  %v1782_v9 = vpop.eup %1781 }
 0x8fe   :  { %v960_v19 = vmul.f32 0.5, %v1782_v9 }
 0x900   :  { %v962_v20 = vadd.f32 0.5, %v960_v19 }
 0x901   :  { %117 = vperm.xlu0 %1722, %v26_v58  }
 0x905   :  { %1723 = vset.pattern.permute.xlu0 %v1853_v2 }
 0x96f   :  { %v978_v21 = vpop.permute.xlu0 %977 }
 0x970   :  { %v980_v22 = vmul.f32 %v978_v21, %v962_v20 }
 0x972   :  { %v986_v24 = vpack.c.bf16 %v980_v22, %v980_v22 }
 0x974   :  { %v987_v50 = vunpack.c.l.bf16 %v986_v24  ;;  %1702 = vmatmul.mubr.msk.bf16.vlgmr.msra.gmra.mxu1 %vm272_vm0, %v986_v24 }
 0x975   :  { %1170 = vmatpush1.bf16.msra.mxu1 %v1895_v1  ;;  %1193 = vmatprep.mubr.bf16.mxu1 %v1853_v2 }
 0x976   :  { %v988_v28 = vsub.f32 %v980_v22, %v987_v50  ;;  %1171 = vmatprep.subr.bf16.mxu1 %v1904_v3  ;;  %v27_v22 = vld [vmem:[%s2443_s0 + $0x28] sm:$0xff] }
 0x978   :  { %v989_v29 = vpack.c.bf16 %v988_v28, %v988_v28 }
 0x979   :  { %1172 = vmatpush1.bf16.msra.mxu1 %v1911_v4 }
 0x97a   :  { %1701 = vmatmul.mubr.msk.bf16.vlgmr.msra.gmra.mxu0 %vm272_vm0, %v989_v29  ;;  %1173 = vmatprep.subr.bf16.mxu1 %v1918_v5 }
 0x97b   :  { %1087 = vmatpush1.bf16.msra.mxu0 %v1958_v12  ;;  %1110 = vmatprep.mubr.bf16.mxu0 %v1853_v2 }
 0x97c   :  { %1088 = vmatprep.subr.bf16.mxu0 %v1964_v13 }
 0x97d   :  { %1174 = vmatpush1.bf16.msra.mxu1 %v1927_v7 }
 0x97e   :  { %1175 = vmatprep.subr.bf16.mxu1 %v1934_v8 }
 0x97f   :  { %1089 = vmatpush1.bf16.msra.mxu0 %v1974_v14 }
 0x980   :  { %1090 = vmatprep.subr.bf16.mxu0 %v1981_v15 }
 0x981   :  { %1176 = vmatpush1.bf16.msra.mxu1 %v1944_v10 }
 0x982   :  { %1254 = vmatprep.subr.bf16.mxu1 %v1951_v11 }
 0x983   :  { %1091 = vmatpush1.bf16.msra.mxu0 %v1990_v16 }
 0x984   :  { %1092 = vmatprep.subr.bf16.mxu0 %v1996_v17 }
 0x987   :  { %1093 = vmatpush1.bf16.msra.mxu0 %v2005_v18 }
 0x988   :  { %1213 = vmatprep.subr.bf16.mxu0 %v1890_v0 }
 0x98a   :  { %1703 = vmatmul.mubr.msk.bf16.vlgmr.msra.gmra.mxu0 %vm272_vm0, %v986_v24 }
 0x98b   :  { %1214 = vmatpush1.bf16.msra.mxu0 %v1895_v1  ;;  %1237 = vmatprep.mubr.bf16.mxu0 %v1853_v2 }
 0x98c   :  { %1215 = vmatprep.subr.bf16.mxu0 %v1904_v3 }
 0x98f   :  { %1216 = vmatpush1.bf16.msra.mxu0 %v1911_v4  ;;  %v118_v4 = vpop.permute.xlu0 %117 }
 0x990   :  { %1217 = vmatprep.subr.bf16.mxu0 %v1918_v5  ;;  %v152_v5 = vmul.f32 %v2041_v41, %v118_v4  ;;  %v151_v53 = vmul.f32 %v2035_v26, %v118_v4 }
 0x992   :  { %v168_v42 = vadd.f32 %v152_v5, %v91_v39  ;;  %v167_v55 = vadd.f32 %v151_v53, %v90_v54 }
 0x993   :  { %1218 = vmatpush1.bf16.msra.mxu0 %v1927_v7 }
 0x994   :  { %1219 = vmatprep.subr.bf16.mxu0 %v1934_v8  ;;  %v196_v46 = vadd.f32 %v2047_v48, %v168_v42  ;;  %v195_v56 = vadd.f32 %v2037_v27, %v167_v55 }
 0x997   :  { %1220 = vmatpush1.bf16.msra.mxu0 %v1944_v10 }
 0x998   :  { %1337 = vmatprep.subr.bf16.mxu0 %v1890_v0 }
 0xa34   :  { %v1071_v30 = vpop.f32.mrf.mxu1 }
 0xa36   :  { %v1073_v31 = vpop.f32.mrf.mxu1 }
 0xa38   :  { %v1075_v32 = vpop.f32.mrf.mxu1 }
 0xa3a   :  { %v1027_v1 = vpop.f32.mrf.mxu0  ;;  %v1076_v33 = vpop.f32.mrf.mxu1 }
 0xa3b   :  { %v1072_v34 = vadd.f32 %v1071_v30, %v1027_v1  ;;  %v2252_v1 = vld [vmem:[%s2445_s2 + $0x30] ss:$8 sps:$4 sm:$0xff]  }
 0xa3c   :  { %v1029_v35 = vpop.f32.mrf.mxu0 }
 0xa3d   :  { %v1074_v44 = vadd.f32 %v1073_v31, %v1029_v35 }
 0xa3e   :  { %v1031_v3 = vpop.f32.mrf.mxu0 }
 0xa3f   :  { %v2265_v3 = vld [vmem:[%s2445_s2 + $0x20] ss:$8 sps:$4 sm:$0xff]  }
 0xa40   :  { %v1032_v36 = vpop.f32.mrf.mxu0 }
 0xa41   :  { %v2272_v36 = vld [vmem:[%s2445_s2 + $0x14] ss:$8 sps:$4 sm:$0xff]  }
 0xa4a   :  { %v1112_v43 = vpop.f32.mrf.mxu0 }
 0xa4b   :  { %v1119_v45 = vadd.f32 %v1112_v43, %v1072_v34  ;;  %v2259_v34 = vld [vmem:[%s2445_s2 + $0x24] ss:$8 sps:$4 sm:$0xff]  }
 0xa4c   :  { %v1114_v0 = vpop.f32.mrf.mxu0 }
 0xa4d   :  { %v1120_v47 = vadd.f32 %v1114_v0, %v1074_v44  ;;  %v1121_v38 = vadd.f32 %v1119_v45, %v195_v56 }
 0xa4e   :  { %v1116_v49 = vpop.f32.mrf.mxu0 }
 0xa4f   :  { %v1122_v23 = vadd.f32 %v1120_v47, %v196_v46  ;;  %v1123_v57 = vmul.f32 0.5, %v1121_v38 }
 0xa50   :  { %v1117_v51 = vpop.f32.mrf.mxu0 }
 0xa51   :  { %1783 = vtanh.f32 %v1122_v23  ;;  %v1124_v24 = vmul.f32 0.5, %v1122_v23 }
 0xa52   :  { %1785 = vtanh.f32 %v1123_v57 }
 0xa5e   :  { %v1784_v52 = vpop.eup %1783 }
 0xa5f   :  { %1134 = vrot.lane.b32.xlu1 %v1784_v52, %s1855_s1  ;;  %v1786_v58 = vpop.eup %1785 }
 0xa60   :  { %v1127_v59 = vmul.f32 0.5, %v1786_v58 }
 0xa62   :  { %v1129_v60 = vadd.f32 0.5, %v1127_v59 }
 0xa64   :  { %v1132_v9 = vmul.f32 %v1129_v60, %v2197_v61 }
 0xad1   :  { %v1135_v62 = vpop.permute.xlu1 %1134 }
 0xad2   :  { %v1137_v63 = vmul.f32 %v1135_v62, %v1129_v60 }
 0xad4   :  { %1139 = vrot.lane.b32.xlu0 %v1137_v63, %s1855_s1 }
 0xad8   :  { %58 = vperm.xlu0 %1723, %v27_v22  }
 0xb46   :  { %v1140_v19 = vpop.permute.xlu0 %1139 }
 0xb47   :  { %v2241_v20 = vadd.f32 %v1140_v19, %v1132_v9 }
 0xb49   :  { %1787 = vtanh.f32 %v2241_v20 }
 0xb4a   :  { %1789 = vtanh.f32 %v1124_v24 }
 0xb53   :  { %v59_v5 = vpop.permute.xlu0 %58 }
 0xb54   :  { %v93_v42 = vmul.f32 %v2039_v40, %v59_v5  ;;  %v92_v55 = vmul.f32 %v2033_v25, %v59_v5 }
 0xb56   :  { %v1788_v21 = vpop.eup %1787 }
 0xb57   :  { %1145 = vrot.lane.b32.xlu1 %v1788_v21, %s1855_s1  ;;  %v1790_v50 = vpop.eup %1789  ;;  %v28_v21 = vld [vmem:[%s2443_s0 + $0x30] sm:$0xff] }
 0xb58   :  { %v1128_v28 = vmul.f32 0.5, %v1790_v50 }
 0xb5a   :  { %v1130_v29 = vadd.f32 0.5, %v1128_v28 }
 0xb5b   :  { %121 = vperm.xlu1 %1724, %v27_v22  }
 0xbc9   :  { %v1146_v61 = vpop.permute.xlu1 %1145 }
 0xbca   :  { %v1148_v30 = vmul.f32 %v1146_v61, %v1130_v29 }
 0xbcc   :  { %v1154_v31 = vpack.c.bf16 %v1148_v30, %v1148_v30 }
 0xbce   :  { %v1155_v32 = vunpack.c.l.bf16 %v1154_v31  ;;  %1705 = vmatmul.mubr.msk.bf16.vlgmr.msra.gmra.mxu0 %vm272_vm0, %v1154_v31 }
 0xbcf   :  { %1338 = vmatpush1.bf16.msra.mxu0 %v2252_v1  ;;  %1361 = vmatprep.mubr.bf16.mxu0 %v1853_v2 }
 0xbd0   :  { %v1156_v33 = vsub.f32 %v1148_v30, %v1155_v32  ;;  %1339 = vmatprep.subr.bf16.mxu0 %v2259_v34 }
 0xbd2   :  { %v1157_v35 = vpack.c.bf16 %v1156_v33, %v1156_v33 }
 0xbd3   :  { %1340 = vmatpush1.bf16.msra.mxu0 %v2265_v3 }
 0xbd4   :  { %1704 = vmatmul.mubr.msk.bf16.vlgmr.msra.gmra.mxu1 %vm272_vm0, %v1157_v35  ;;  %1341 = vmatprep.subr.bf16.mxu0 %v2272_v36 }
 0xbd5   :  { %1255 = vmatpush1.bf16.msra.mxu1 %v1958_v12  ;;  %1278 = vmatprep.mubr.bf16.mxu1 %v1853_v2 }
 0xbd6   :  { %1256 = vmatprep.subr.bf16.mxu1 %v1964_v13  ;;  %v122_v39 = vpop.permute.xlu1 %121 }
 0xbd7   :  { %1342 = vmatpush1.bf16.msra.mxu0 %v1927_v7  ;;  %v2290_v7 = vld [vmem:[%s2445_s2 + $0x34] ss:$8 sps:$4 sm:$0xff]   ;;  %v154_v43 = vmul.f32 %v2041_v41, %v122_v39  ;;  %v153_v56 = vmul.f32 %v2035_v26, %v122_v39 }
 0xbd8   :  { %1343 = vmatprep.subr.bf16.mxu0 %v1934_v8  ;;  %v2302_v8 = vld [vmem:[%s2445_s2 + $0x10] ss:$8 sps:$4 sm:$0xff]  }
 0xbd9   :  { %1257 = vmatpush1.bf16.msra.mxu1 %v1974_v14  ;;  %v170_v44 = vadd.f32 %v154_v43, %v93_v42  ;;  %v169_v38 = vadd.f32 %v153_v56, %v92_v55 }
 0xbda   :  { %1258 = vmatprep.subr.bf16.mxu1 %v1981_v15 }
 0xbdb   :  { %1344 = vmatpush1.bf16.msra.mxu0 %v1944_v10  ;;  %v2308_v10 = vld [vmem:[%s2445_s2 + $0x4] ss:$8 sps:$4 sm:$0xff]   ;;  %v198_v47 = vadd.f32 %v2047_v48, %v170_v44  ;;  %v197_v57 = vadd.f32 %v2037_v27, %v169_v38 }
 0xbdc   :  { %1422 = vmatprep.subr.bf16.mxu0 %v1951_v11  ;;  %v2314_v11 = vld [vmem:[%s2445_s2] ss:$8 sps:$4 sm:$0xff]  }
 0xbdd   :  { %1259 = vmatpush1.bf16.msra.mxu1 %v1990_v16 }
 0xbde   :  { %1260 = vmatprep.subr.bf16.mxu1 %v1996_v17 }
 0xbe1   :  { %1261 = vmatpush1.bf16.msra.mxu1 %v2005_v18 }
 0xbe2   :  { %1381 = vmatprep.subr.bf16.mxu1 %v2290_v7 }
 0xbe4   :  { %1706 = vmatmul.mubr.msk.bf16.vlgmr.msra.gmra.mxu1 %vm272_vm0, %v1154_v31 }
 0xbe5   :  { %1382 = vmatpush1.bf16.msra.mxu1 %v2252_v1  ;;  %1405 = vmatprep.mubr.bf16.mxu1 %v1853_v2 }
 0xbe6   :  { %1383 = vmatprep.subr.bf16.mxu1 %v2259_v34 }
 0xbe9   :  { %1384 = vmatpush1.bf16.msra.mxu1 %v2265_v3 }
 0xbea   :  { %1385 = vmatprep.subr.bf16.mxu1 %v2272_v36 }
 0xbed   :  { %1386 = vmatpush1.bf16.msra.mxu1 %v2302_v8 }
 0xbee   :  { %1387 = vmatprep.subr.bf16.mxu1 %v2308_v10 }
 0xbf1   :  { %1388 = vmatpush1.bf16.msra.mxu1 %v2314_v11 }
 0xbf2   :  { %1505 = vmatprep.subr.bf16.mxu1 %v2290_v7 }
 0xc8e   :  { %v1239_v12 = vpop.f32.mrf.mxu0 }
 0xc90   :  { %v1241_v13 = vpop.f32.mrf.mxu0 }
 0xc92   :  { %v1243_v14 = vpop.f32.mrf.mxu0 }
 0xc93   :  { %v2353_v14 = vld [vmem:[%s2446_s3 + $0x24] ss:$8 sps:$4 sm:$0xff]  }
 0xc94   :  { %v1195_v15 = vpop.f32.mrf.mxu1  ;;  %v1244_v16 = vpop.f32.mrf.mxu0 }
 0xc95   :  { %v1240_v17 = vadd.f32 %v1239_v12, %v1195_v15  ;;  %v2361_v15 = vld [vmem:[%s2446_s3 + $0x20] ss:$8 sps:$4 sm:$0xff]   ;;  %v2367_v16 = vld [vmem:[%s2446_s3 + $0x14] ss:$8 sps:$4 sm:$0xff]  }
 0xc96   :  { %v1197_v18 = vpop.f32.mrf.mxu1 }
 0xc97   :  { %v1242_v0 = vadd.f32 %v1241_v13, %v1197_v18  ;;  %v2346_v13 = vld [vmem:[%s2446_s3 + $0x30] ss:$8 sps:$4 sm:$0xff]  }
 0xc98   :  { %v1199_v4 = vpop.f32.mrf.mxu1  ;;  %v2377_v18 = vld [vmem:[%s2446_s3 + $0x10] ss:$8 sps:$4 sm:$0xff]  }
 0xc99   :  { %v2383_v4 = vld [vmem:[%s2446_s3 + $0x4] ss:$8 sps:$4 sm:$0xff]  }
 0xc9a   :  { %v1200_v37 = vpop.f32.mrf.mxu1 }
 0xc9b   :  { %v2389_v37 = vld [vmem:[%s2446_s3] ss:$8 sps:$4 sm:$0xff]  }
 0xca4   :  { %v1280_v45 = vpop.f32.mrf.mxu1 }
 0xca5   :  { %v1287_v46 = vadd.f32 %v1280_v45, %v1240_v17  ;;  %v1827_v17 = vld [vmem:[%s2446_s3 + $0x34] ss:$8 sps:$4 sm:$0xff]  }
 0xca6   :  { %v1282_v49 = vpop.f32.mrf.mxu1 }
 0xca7   :  { %v1288_v23 = vadd.f32 %v1282_v49, %v1242_v0  ;;  %v1289_v58 = vadd.f32 %v1287_v46, %v197_v57 }
 0xca8   :  { %v1284_v51 = vpop.f32.mrf.mxu1 }
 0xca9   :  { %v1290_v52 = vadd.f32 %v1288_v23, %v198_v47  ;;  %v1291_v59 = vmul.f32 0.5, %v1289_v58 }
 0xcaa   :  { %v1285_v53 = vpop.f32.mrf.mxu1 }
 0xcab   :  { %1791 = vtanh.f32 %v1290_v52  ;;  %v1292_v29 = vmul.f32 0.5, %v1290_v52 }
 0xcac   :  { %1793 = vtanh.f32 %v1291_v59 }
 0xcb8   :  { %v1792_v54 = vpop.eup %1791 }
 0xcb9   :  { %1302 = vrot.lane.b32.xlu1 %v1792_v54, %s1855_s1  ;;  %v1794_v60 = vpop.eup %1793 }
 0xcba   :  { %v1295_v62 = vmul.f32 0.5, %v1794_v60 }
 0xcbc   :  { %v1297_v63 = vadd.f32 0.5, %v1295_v62 }
 0xcbe   :  { %v1300_v22 = vmul.f32 %v1297_v63, %v2241_v20 }
 0xd2b   :  { %v1303_v9 = vpop.permute.xlu1 %1302 }
 0xd2c   :  { %v1305_v19 = vmul.f32 %v1303_v9, %v1297_v63 }
 0xd2e   :  { %1307 = vrot.lane.b32.xlu0 %v1305_v19, %s1855_s1 }
 0xd32   :  { %63 = vperm.xlu0 %1723, %v28_v21  }
 0xd36   :  { %1726 = vset.pattern.permute.xlu0 %v1854_v6 }
 0xda0   :  { %v1308_v24 = vpop.permute.xlu0 %1307 }
 0xda1   :  { %v2331_v50 = vadd.f32 %v1308_v24, %v1300_v22 }
 0xda3   :  { %1795 = vtanh.f32 %v2331_v50 }
 0xda4   :  { %1797 = vtanh.f32 %v1292_v29 }
 0xdad   :  { %v64_v46 = vpop.permute.xlu0 %63 }
 0xdae   :  { %v94_v38 = vmul.f32 %v2033_v25, %v64_v46 }
 0xdb0   :  { %v1796_v28 = vpop.eup %1795 }
 0xdb1   :  { %1313 = vrot.lane.b32.xlu1 %v1796_v28, %s1855_s1  ;;  %v1798_v61 = vpop.eup %1797 }
 0xdb2   :  { %v1296_v30 = vmul.f32 0.5, %v1798_v61  ;;  %v29_v61 = vld [vmem:[%s2443_s0 + $0x38] sm:$0xff]  ;;  %s1856_s0 = smov [#allocation3]  }
 0xdb3   :  { %s1660_s25 = sshll.u32 %s1856_s0, 4  ;;  %s1661_s25 = int_to_ptr.vmem [resolvable:$true] %s1660_s25 }
 0xdb4   :  { %v1298_v31 = vadd.f32 0.5, %v1296_v30  ;;  %s1831_s26 = scalar_lea.vmem %s1661_s25, 128  ;;  %p1836_p1 = scmp.lt.s32.totalorder %s1661_s25, %s1661_s25 }
 0xdb5   :  { %125 = vperm.xlu1 %1724, %v28_v21   ;;  %p1832_p0 = scmp.ne.s32.totalorder %s1661_s25, %s1831_s26  ;;  %p1837_p2 = scmp.lt.s32.totalorder %s1831_s26, %s1831_s26 }
 0xdb7   :  { %p1838_p3 = por %p1837_p2, %p1836_p1 }
 0xdb9   :  { %1725 = vset.pattern.permute.xlu1 %v1853_v2  ;;  %p1839_p4 = pnand %p1838_p3, %p1832_p0 }
 0xe23   :  { %v1314_v32 = vpop.permute.xlu1 %1313 }
 0xe24   :  { %v1316_v6 = vmul.f32 %v1314_v32, %v1298_v31 }
 0xe26   :  { %v1322_v33 = vpack.c.bf16 %v1316_v6, %v1316_v6 }
 0xe28   :  { %v1323_v20 = vunpack.c.l.bf16 %v1322_v33  ;;  %1708 = vmatmul.mubr.msk.bf16.vlgmr.msra.gmra.mxu1 %vm272_vm0, %v1322_v33 }
 0xe29   :  { %1506 = vmatpush1.bf16.msra.mxu1 %v2252_v1  ;;  %1529 = vmatprep.mubr.bf16.mxu1 %v1853_v2 }
 0xe2a   :  { %v1324_v35 = vsub.f32 %v1316_v6, %v1323_v20  ;;  %1507 = vmatprep.subr.bf16.mxu1 %v2259_v34 }
 0xe2c   :  { %v1325_v12 = vpack.c.bf16 %v1324_v35, %v1324_v35 }
 0xe2d   :  { %1508 = vmatpush1.bf16.msra.mxu1 %v2265_v3 }
 0xe2e   :  { %1707 = vmatmul.mubr.msk.bf16.vlgmr.msra.gmra.mxu0 %vm272_vm0, %v1325_v12  ;;  %1509 = vmatprep.subr.bf16.mxu1 %v2272_v36 }
 0xe2f   :  { %1423 = vmatpush1.bf16.msra.mxu0 %v2346_v13  ;;  %1446 = vmatprep.mubr.bf16.mxu0 %v1853_v2 }
 0xe30   :  { %1424 = vmatprep.subr.bf16.mxu0 %v2353_v14 }
 0xe31   :  { %1510 = vmatpush1.bf16.msra.mxu1 %v2302_v8 }
 0xe32   :  { %1511 = vmatprep.subr.bf16.mxu1 %v2308_v10 }
 0xe33   :  { %1425 = vmatpush1.bf16.msra.mxu0 %v2361_v15 }
 0xe34   :  { %1426 = vmatprep.subr.bf16.mxu0 %v2367_v16 }
 0xe35   :  { %1512 = vmatpush1.bf16.msra.mxu1 %v2314_v11 }
 0xe36   :  { %1590 = vmatprep.subr.bf16.mxu1 %v1827_v17 }
 0xe37   :  { %1427 = vmatpush1.bf16.msra.mxu0 %v2377_v18 }
 0xe38   :  { %1428 = vmatprep.subr.bf16.mxu0 %v2383_v4 }
 0xe3b   :  { %1429 = vmatpush1.bf16.msra.mxu0 %v2389_v37 }
 0xe3c   :  { %1549 = vmatprep.subr.bf16.mxu0 %v2290_v7 }
 0xe3e   :  { %1709 = vmatmul.mubr.msk.bf16.vlgmr.msra.gmra.mxu0 %vm272_vm0, %v1322_v33 }
 0xe3f   :  { %1550 = vmatpush1.bf16.msra.mxu0 %v2252_v1  ;;  %1573 = vmatprep.mubr.bf16.mxu0 %v1853_v2 }
 0xe40   :  { %1551 = vmatprep.subr.bf16.mxu0 %v2259_v34  ;;  %v126_v34 = vpop.permute.xlu1 %125 }
 0xe41   :  { %v155_v56 = vmul.f32 %v2035_v26, %v126_v34 }
 0xe43   :  { %1552 = vmatpush1.bf16.msra.mxu0 %v2265_v3  ;;  %v156_v3 = vmul.f32 %v2041_v41, %v126_v34  ;;  %v171_v57 = vadd.f32 %v155_v56, %v94_v38 }
 0xe44   :  { %1553 = vmatprep.subr.bf16.mxu0 %v2272_v36  ;;  %v95_v36 = vmul.f32 %v2039_v40, %v64_v46 }
 0xe45   :  { %v199_v58 = vadd.f32 %v2037_v27, %v171_v57 }
 0xe47   :  { %1554 = vmatpush1.bf16.msra.mxu0 %v2302_v8  ;;  %v172_v8 = vadd.f32 %v156_v3, %v95_v36 }
 0xe48   :  { %1555 = vmatprep.subr.bf16.mxu0 %v2308_v10 }
 0xe49   :  { %v200_v23 = vadd.f32 %v2047_v48, %v172_v8 }
 0xe4b   :  { %1556 = vmatpush1.bf16.msra.mxu0 %v2314_v11 }
 0xee8   :  { %v1407_v5 = vpop.f32.mrf.mxu1 }
 0xeea   :  { %v1409_v7 = vpop.f32.mrf.mxu1 }
 0xeec   :  { %v1411_v39 = vpop.f32.mrf.mxu1 }
 0xeee   :  { %v1363_v42 = vpop.f32.mrf.mxu0  ;;  %v1412_v43 = vpop.f32.mrf.mxu1 }
 0xeef   :  { %v1408_v1 = vadd.f32 %v1407_v5, %v1363_v42 }
 0xef0   :  { %v1365_v44 = vpop.f32.mrf.mxu0 }
 0xef1   :  { %v1410_v10 = vadd.f32 %v1409_v7, %v1365_v44 }
 0xef2   :  { %v1367_v45 = vpop.f32.mrf.mxu0 }
 0xef4   :  { %v1368_v0 = vpop.f32.mrf.mxu0 }
 0xefe   :  { %v1448_v47 = vpop.f32.mrf.mxu0 }
 0xeff   :  { %v1455_v49 = vadd.f32 %v1448_v47, %v1408_v1 }
 0xf00   :  { %v1450_v11 = vpop.f32.mrf.mxu0 }
 0xf01   :  { %v1456_v51 = vadd.f32 %v1450_v11, %v1410_v10  ;;  %v1457_v59 = vadd.f32 %v1455_v49, %v199_v58 }
 0xf02   :  { %v1452_v52 = vpop.f32.mrf.mxu0 }
 0xf03   :  { %v1458_v53 = vadd.f32 %v1456_v51, %v200_v23  ;;  %v1459_v60 = vmul.f32 0.5, %v1457_v59 }
 0xf04   :  { %v1453_v54 = vpop.f32.mrf.mxu0 }
 0xf05   :  { %1799 = vtanh.f32 %v1458_v53  ;;  %v1460_v30 = vmul.f32 0.5, %v1458_v53 }
 0xf06   :  { %1801 = vtanh.f32 %v1459_v60 }
 0xf12   :  { %v1800_v55 = vpop.eup %1799 }
 0xf13   :  { %1470 = vrot.lane.b32.xlu0 %v1800_v55, %s1855_s1  ;;  %v1802_v62 = vpop.eup %1801 }
 0xf14   :  { %v1463_v63 = vmul.f32 0.5, %v1802_v62 }
 0xf16   :  { %v1465_v9 = vadd.f32 0.5, %v1463_v63 }
 0xf18   :  { %v1468_v22 = vmul.f32 %v1465_v9, %v2331_v50 }
 0xf85   :  { %v1471_v19 = vpop.permute.xlu0 %1470 }
 0xf86   :  { %v1473_v21 = vmul.f32 %v1471_v19, %v1465_v9 }
 0xf88   :  { %1475 = vrot.lane.b32.xlu1 %v1473_v21, %s1855_s1 }
 0xf8c   :  { %68 = vperm.xlu1 %1725, %v29_v61  }
 0xffa   :  { %v1476_v24 = vpop.permute.xlu1 %1475 }
 0xffb   :  { %v2411_v28 = vadd.f32 %v1476_v24, %v1468_v22 }
 0xffd   :  { %1803 = vtanh.f32 %v2411_v28 }
 0xffe   :  { %1805 = vtanh.f32 %v1460_v30 }
0x100a   :  { %v1804_v29 = vpop.eup %1803 }
0x100b   :  { %1481 = vrot.lane.b32.xlu0 %v1804_v29, %s1855_s1  ;;  %v1806_v31 = vpop.eup %1805 }
0x100c   :  { %v1464_v32 = vmul.f32 0.5, %v1806_v31 }
0x100e   :  { %v1466_v6 = vadd.f32 0.5, %v1464_v32 }
0x100f   :  { %129 = vperm.xlu0 %1726, %v29_v61  }
0x107d   :  { %v1482_v50 = vpop.permute.xlu0 %1481 }
0x107e   :  { %v1484_v33 = vmul.f32 %v1482_v50, %v1466_v6 }
0x1080   :  { %v1490_v20 = vpack.c.bf16 %v1484_v33, %v1484_v33 }
0x1082   :  { %v1491_v35 = vunpack.c.l.bf16 %v1490_v20  ;;  %1711 = vmatmul.mubr.msk.bf16.vlgmr.msra.gmra.mxu0 %vm272_vm0, %v1490_v20 }
0x1084   :  { %v1492_v12 = vsub.f32 %v1484_v33, %v1491_v35 }
0x1086   :  { %v1493_v17 = vpack.c.bf16 %v1492_v12, %v1492_v12 }
0x1088   :  { %1710 = vmatmul.mubr.msk.bf16.vlgmr.msra.gmra.mxu1 %vm272_vm0, %v1493_v17 }
0x1089   :  { %1591 = vmatpush1.bf16.msra.mxu1 %v2346_v13  ;;  %1614 = vmatprep.mubr.bf16.mxu1 %v1853_v2 }
0x108a   :  { %1592 = vmatprep.subr.bf16.mxu1 %v2353_v14  ;;  %v130_v44 = vpop.permute.xlu0 %129 }
0x108d   :  { %1593 = vmatpush1.bf16.msra.mxu1 %v2361_v15  ;;  %v69_v15 = vpop.permute.xlu1 %68 }
0x108e   :  { %1594 = vmatprep.subr.bf16.mxu1 %v2367_v16  ;;  %v97_v16 = vmul.f32 %v2039_v40, %v69_v15  ;;  %v96_v49 = vmul.f32 %v2033_v25, %v69_v15  ;;  %v157_v40 = vmul.f32 %v2035_v26, %v130_v44 }
0x1091   :  { %1595 = vmatpush1.bf16.msra.mxu1 %v2377_v18  ;;  %v158_v18 = vmul.f32 %v2041_v41, %v130_v44  ;;  %v173_v41 = vadd.f32 %v157_v40, %v96_v49 }
0x1092   :  { %1596 = vmatprep.subr.bf16.mxu1 %v2383_v4 }
0x1093   :  { %v174_v4 = vadd.f32 %v158_v18, %v97_v16  ;;  %v201_v11 = vadd.f32 %v2037_v27, %v173_v41 }
0x1095   :  { %1597 = vmatpush1.bf16.msra.mxu1 %v2389_v37  ;;  %v202_v34 = vadd.f32 %v2047_v48, %v174_v4 }
0x1098   :  { %1712 = vmatmul.mubr.msk.bf16.vlgmr.msra.gmra.mxu1 %vm272_vm0, %v1490_v20 }
0x1142   :  { %v1575_v5 = vpop.f32.mrf.mxu0 }
0x1144   :  { %v1577_v7 = vpop.f32.mrf.mxu0 }
0x1146   :  { %v1579_v39 = vpop.f32.mrf.mxu0 }
0x1148   :  { %v1531_v13 = vpop.f32.mrf.mxu1  ;;  %v1580_v42 = vpop.f32.mrf.mxu0 }
0x1149   :  { %v1576_v2 = vadd.f32 %v1575_v5, %v1531_v13 }
0x114a   :  { %v1533_v43 = vpop.f32.mrf.mxu1 }
0x114b   :  { %v1578_v37 = vadd.f32 %v1577_v7, %v1533_v43 }
0x114c   :  { %v1535_v14 = vpop.f32.mrf.mxu1 }
0x114e   :  { %v1536_v1 = vpop.f32.mrf.mxu1 }
0x1158   :  { %v1616_v45 = vpop.f32.mrf.mxu1 }
0x1159   :  { %v1623_v0 = vadd.f32 %v1616_v45, %v1576_v2 }
0x115a   :  { %v1618_v46 = vpop.f32.mrf.mxu1 }
0x115b   :  { %v1624_v3 = vadd.f32 %v1618_v46, %v1578_v37  ;;  %v1625_v23 = vadd.f32 %v1623_v0, %v201_v11 }
0x115c   :  { %v1620_v36 = vpop.f32.mrf.mxu1 }
0x115d   :  { %v1626_v8 = vadd.f32 %v1624_v3, %v202_v34  ;;  %v1627_v51 = vmul.f32 0.5, %v1625_v23 }
0x115e   :  { %v1621_v47 = vpop.f32.mrf.mxu1 }
0x115f   :  { %1807 = vtanh.f32 %v1626_v8  ;;  %v1628_v26 = vmul.f32 0.5, %v1626_v8 }
0x1160   :  { %1809 = vtanh.f32 %v1627_v51 }
0x116c   :  { %v1808_v10 = vpop.eup %1807 }
0x116d   :  { %1638 = vrot.lane.b32.xlu1 %v1808_v10, %s1855_s1  ;;  %v1810_v48 = vpop.eup %1809 }
0x116e   :  { %v1631_v52 = vmul.f32 0.5, %v1810_v48 }
0x1170   :  { %v1633_v53 = vadd.f32 0.5, %v1631_v52 }
0x1172   :  { %v1636_v56 = vmul.f32 %v1633_v53, %v2411_v28 }
0x11df   :  { %v1639_v54 = vpop.permute.xlu1 %1638 }
0x11e0   :  { %v1641_v55 = vmul.f32 %v1639_v54, %v1633_v53 }
0x11e2   :  { %1643 = vrot.lane.b32.xlu1 %v1641_v55, %s1855_s1 }
0x1254   :  { %v1644_v38 = vpop.permute.xlu1 %1643 }
0x1255   :  { %v1646_v57 = vadd.f32 %v1644_v38, %v1636_v56 }
0x1257   :  { %1811 = vtanh.f32 %v1646_v57 }
0x1258   :  { %1813 = vtanh.f32 %v1628_v26 }
0x1264   :  { %v1812_v25 = vpop.eup %1811 }
0x1265   :  { %1649 = vrot.lane.b32.xlu0 %v1812_v25, %s1855_s1  ;;  %v1814_v27 = vpop.eup %1813 }
0x1266   :  { %v1632_v58 = vmul.f32 0.5, %v1814_v27 }
0x1268   :  { %v1634_v59 = vadd.f32 0.5, %v1632_v58 }
0x12d7   :  { %v1650_v60 = vpop.permute.xlu0 %1649 }
0x12d8   :  { %v1652_v62 = vmul.f32 %v1650_v60, %v1634_v59 }
0x12da   :  { %1653 = vst.msk [vmem:[#allocation3] sm:$0xff] %vm272_vm0, %v1652_v62 }
0x12db   :  { %1842 = shalt.err (!%p1839_p4)
}
0x12dc   :  { %1663 = dma.vmem_to_hbm [thread:$0]  %s1661_s25, 128, %s2448_s5, [#allocation4]  }
0x12dd   :  { %1851 = dma.done.wait [#allocation4], 128  }
0x12de   :  { %1852 = vsyncadd [#allocation4], 4294967168 }
0x12df   :  { %1667 = vsyncpa [#allocation4], 1 }

</bundles_post_ra>
